<compile_context>
chip_gen: v7x
topology: tpu7x:2x2x1
jax: 0.10.0
libtpu: 0.0.40
codegen_flags: <defaults>
</compile_context>

<pallas_src>
import functools
import numpy as np
import jax
import jax.numpy as jnp
from jax.experimental import pallas as pl
from jax.experimental.pallas import tpu as pltpu

EPS = 1e-5
_VMEM = pl.BlockSpec(memory_space=pltpu.MemorySpace.VMEM)


# ------------------------- weight-side operator folding ----------------------

def depth_conv_operator(w, b, d_in, stride, pad, scale):
    """Fold Conv3d((k,1,1)) + eval-BN scale into one (C_out*D_out, C_in*D_in) matrix."""
    c_out, c_in, k = w.shape
    d_out_n = (d_in + 2 * pad - k) // stride + 1
    do = np.arange(d_out_n)[:, None]
    di = np.arange(d_in)[None, :]
    kd = di - do * stride + pad                       # (D_out, D_in)
    valid = jnp.asarray(((kd >= 0) & (kd < k)).astype(np.float32))
    kd_c = np.clip(kd, 0, k - 1)
    m = w[:, :, kd_c] * valid                         # (C_out, C_in, D_out, D_in)
    m = jnp.transpose(m, (0, 2, 1, 3)).reshape(c_out * d_out_n, c_in * d_in)
    shift = jnp.repeat(b, d_out_n) * scale if b is not None else None
    return (m * scale).astype(jnp.bfloat16), shift, d_out_n


def block_diag_grouped(gw, groups):
    """Grouped 1x1 conv (groups=C) -> block-diagonal (C*D, C*D) matrix (no python loop)."""
    cd, d = gw.shape
    c = groups
    gwr = gw.reshape(c, d, d)
    eye = jnp.eye(c, dtype=gw.dtype)
    return (gwr[:, :, None, :] * eye[:, None, :, None]).reshape(cd, cd)


def pool_matrix(h, w, k):
    """(HW, HW) operator: x @ P == AvgPool2d(k, stride 1, same, count_include_pad)."""
    r = k // 2
    idx = np.arange(h * w)
    ii, jj = idx // w, idx % w
    m = (np.abs(ii[:, None] - ii[None, :]) <= r) & (np.abs(jj[:, None] - jj[None, :]) <= r)
    return m.astype(np.float32) / float(k * k)


def shift_matrices_3x3(h, w):
    """(9*HW, HW) stacked shift operators: (x @ S_kk)[., hw] = x[., hw shifted by (a-1,b-1)]."""
    hw = h * w
    s = np.zeros((9, hw, hw), np.float32)
    for a in range(3):
        for b in range(3):
            kk = a * 3 + b
            for i in range(h):
                for j in range(w):
                    si, sj = i + a - 1, j + b - 1
                    if 0 <= si < h and 0 <= sj < w:
                        s[kk, si * w + sj, i * w + j] = 1.0
    return s.reshape(9 * hw, hw)


def pack_biases(segments):
    """Pack per-row shift vectors into one (T,1) f32 array with 8-aligned offsets."""
    offs, parts, off = {}, [], 0
    for name, v in segments:
        n = int(v.shape[0])
        pad = (-n) % 8
        offs[name] = (off, n)
        parts.append(v.astype(jnp.float32))
        if pad:
            parts.append(jnp.zeros((pad,), jnp.float32))
        off += n + pad
    return jnp.concatenate(parts, axis=0).reshape(off, 1), offs


# ------------------------------ the mega-kernel ------------------------------

def _cnn_megakernel(xs_ref, xr_ref,
                    a1_ref, a2a_ref, a2b_ref, g1_ref, a3_ref, a4a_ref, a4b_ref,
                    g2_ref, ahe_ref, apre1_ref, apre2_ref,
                    e1_ref, e2_ref, e3_ref, adl_ref, acla1_ref, acla2_ref,
                    p7_ref, p5_ref, s9_ref, bias_ref,
                    out_ref, *, bias_slc, c_bn, nc, hw):
    f32, bf16 = jnp.float32, jnp.bfloat16

    def bias(name):
        off, n = bias_slc[name]
        return bias_ref[off:off + n, :]                 # (n, 1) f32, broadcast over lanes

    def sigmoid(y):
        # exp -> EUP, approx reciprocal -> EUP: keeps the VALU slot free.
        return pl.reciprocal(1.0 + jnp.exp(-y), approx=True)

    def layer(a_ref, x, b=None, act="relu"):
        # bf16 MXU matmul, f32 accumulate, f32 epilogue (v5e-safe).
        y = jnp.dot(a_ref[...], x.astype(bf16), preferred_element_type=f32)
        if b is not None:
            y = y + b
        if act == "relu":
            y = jnp.maximum(y, 0.0)
        elif act == "sigmoid":
            y = sigmoid(y)
        return y

    def pool(x, p_ref):
        # AvgPool (stride 1, same, count_include_pad) as one right-side matmul.
        return jnp.dot(x.astype(bf16), p_ref[...], preferred_element_type=f32)

    # ---------------- spectral branch: activations are (C*D, H*W) ----------------
    x0 = xs_ref[...]
    x1 = layer(a1_ref, x0, bias("b1"))                          # spe1
    h = layer(a2a_ref, x1, bias("b2a"))                         # spe2
    h = layer(a2b_ref, h, bias("b2b"))
    x21 = h + x1                                                # fused residual
    w1 = layer(g1_ref, pool(x21, p7_ref), bias("gb1"), act="sigmoid")   # SAM1
    x21 = jnp.maximum(w1 * x21 * c_bn, 0.0) + x21
    x31 = layer(a3_ref, x21, bias("b3"))                        # spe3
    h = layer(a4a_ref, x31, bias("b4a"))                        # spe4
    h = layer(a4b_ref, h, bias("b4b"))
    x41 = h + x31
    w2 = layer(g2_ref, pool(x41, p7_ref), bias("gb2"), act="sigmoid")   # SAM2
    x41 = jnp.maximum(w2 * x41 * c_bn, 0.0) + x41
    xhe = layer(ahe_ref, x41, bias("bhe"))                      # spehe
    hpre = layer(apre1_ref, pool(xhe, p5_ref), bias("bpre1"))   # spepre (Dropout eval=id)
    y_spe = layer(apre2_ref, hpre, bias("bpre2"), act=None)     # (nc, hw)

    # ---------------- rgb branch ----------------
    r = layer(e1_ref, xr_ref[...])
    r = layer(e2_ref, r)
    r = layer(e3_ref, r, bias("be3"))
    # TODO(synk): pretrained torchvision deeplabv3_resnet50 is not translated;
    #             a 1x1-conv segmentation-head stand-in (3 -> num_class) is used.
    y_rgb = layer(adl_ref, r, bias("bdl"), act=None)            # (nc, hw)

    # ---------------- fusion head: 3x3 conv via shift matrices ----------------
    feat = jnp.concatenate([y_spe, y_rgb], axis=0).astype(bf16)  # (2*nc, hw)
    cols = []
    for kk in range(9):
        s_kk = s9_ref[kk * hw:(kk + 1) * hw, :]                  # (hw, hw) bf16
        cols.append(jnp.dot(feat, s_kk, preferred_element_type=f32).astype(bf16))
    xcol = jnp.concatenate(cols, axis=0)                         # (9*2*nc, hw)
    hcla = jnp.maximum(jnp.dot(acla1_ref[...], xcol, preferred_element_type=f32), 0.0)
    y_last = layer(acla2_ref, hcla, bias("bcla2"), act=None)     # (nc, hw)

    # one packed store for all three heads
    out_ref[...] = jnp.concatenate([y_spe, y_rgb, y_last], axis=0)


# ------------------------------- full forward --------------------------------

def cnn_forward(p, inputx, inputrgb):
    band, H, W = inputx.shape[1], inputx.shape[2], inputx.shape[3]
    HW = H * W
    nc = p["cla_w2"].shape[0]
    c = float(1.0 / np.sqrt(1.0 + EPS))                 # eval-mode fresh-stats BN scale
    bf = jnp.bfloat16

    # ---- fold all conv weights + BN scales into dense operators (weight-side) ----
    A1, b1, B1d = depth_conv_operator(p["spe1_w"], p["spe1_b"], band, 2, 0, c)
    A2a, b2a, _ = depth_conv_operator(p["spe2_w1"], p["spe2_b1"], B1d, 1, 3, c)
    A2b, b2b, _ = depth_conv_operator(p["spe2_w2"], p["spe2_b2"], B1d, 1, 3, c)
    A3, b3, B2d = depth_conv_operator(p["spe3_w"], p["spe3_b"], B1d, 2, 0, c)
    A4a, b4a, _ = depth_conv_operator(p["spe4_w1"], p["spe4_b1"], B2d, 1, 1, c)
    A4b, b4b, _ = depth_conv_operator(p["spe4_w2"], p["spe4_b2"], B2d, 1, 1, c)
    Ahe, bhe, _ = depth_conv_operator(p["spehe_w"], p["spehe_b"], B2d, 1, 0, c)

    G1 = block_diag_grouped(p["sam1_gw"], 4).astype(bf)
    G2 = block_diag_grouped(p["sam2_gw"], 16).astype(bf)

    Apre1 = (p["spepre_w1"] * c).astype(bf)
    Apre2 = p["spepre_w2"].astype(bf)
    E1 = (p["enc1_w"] * c).astype(bf)
    E2 = (p["enc2_w"] * c).astype(bf)
    E3 = (p["enc3_w"] * c).astype(bf)
    Adl = p["deeplab_w"].astype(bf)
    Acla1 = (jnp.transpose(p["cla_w1"], (0, 2, 3, 1)).reshape(nc * 10, 9 * nc * 2) * c).astype(bf)
    Acla2 = p["cla_w2"].astype(bf)

    P7 = jnp.asarray(pool_matrix(H, W, 7), bf)
    P5 = jnp.asarray(pool_matrix(H, W, 5), bf)
    S9 = jnp.asarray(shift_matrices_3x3(H, W), bf)

    bias_packed, bias_slc = pack_biases([
        ("b1", b1), ("b2a", b2a), ("b2b", b2b), ("gb1", p["sam1_gb"]),
        ("b3", b3), ("b4a", b4a), ("b4b", b4b), ("gb2", p["sam2_gb"]),
        ("bhe", bhe), ("bpre1", p["spepre_b1"] * c), ("bpre2", p["spepre_b2"]),
        ("be3", p["enc3_b"] * c), ("bdl", p["deeplab_b"]), ("bcla2", p["cla_b2"]),
    ])

    xs = inputx[0].reshape(band, HW).astype(jnp.float32)     # (C=1 folded) spectral cube
    xr = inputrgb[0].reshape(band, HW).astype(jnp.float32)

    kern = functools.partial(_cnn_megakernel, bias_slc=bias_slc, c_bn=c, nc=nc, hw=HW)
    operands = (xs, xr, A1, A2a, A2b, G1, A3, A4a, A4b, G2, Ahe,
                Apre1, Apre2, E1, E2, E3, Adl, Acla1, Acla2, P7, P5, S9, bias_packed)
    out = pl.pallas_call(
        kern,
        out_shape=jax.ShapeDtypeStruct((3 * nc, HW), jnp.float32),
        in_specs=[_VMEM] * len(operands),
        out_specs=_VMEM,
    )(*operands)

    output_spe = out[0:nc].reshape(1, nc, H, W)
    xrgbout = out[nc:2 * nc].reshape(1, nc, H, W)
    outputlast = out[2 * nc:3 * nc].reshape(1, nc, H, W)
    return output_spe, xrgbout, xrgbout, outputlast


# ------------------------------- parameters ----------------------------------

def init_params(key, band_num, num_class, B1, B2):
    ks = iter(jax.random.split(key, 40))

    def w(shape, s=0.1):
        return (s * jax.random.normal(next(ks), shape)).astype(jnp.float32)

    def b(n):
        return (0.01 * jax.random.normal(next(ks), (n,))).astype(jnp.float32)

    return dict(
        spe1_w=w((4, 1, 7)), spe1_b=b(4),
        spe2_w1=w((16, 4, 7)), spe2_b1=b(16),
        spe2_w2=w((4, 16, 7)), spe2_b2=b(4),
        spe3_w=w((16, 4, 7)), spe3_b=b(16),
        spe4_w1=w((8, 16, 3)), spe4_b1=b(8),
        spe4_w2=w((16, 8, 3)), spe4_b2=b(16),
        spehe_w=w((16, 16, B2)), spehe_b=b(16),
        spepre_w1=w((32, 16)), spepre_b1=b(32),
        spepre_w2=w((num_class, 32)), spepre_b2=b(num_class),
        sam1_gw=w((4 * B1, B1)), sam1_gb=b(4 * B1),
        sam2_gw=w((16 * B2, B2)), sam2_gb=b(16 * B2),
        enc1_w=w((band_num // 2, band_num)),
        enc2_w=w((band_num // 4, band_num // 2)),
        enc3_w=w((3, band_num // 4)), enc3_b=b(3),
        deeplab_w=w((num_class, 3)), deeplab_b=b(num_class),
        cla_w1=w((num_class * 10, num_class * 2, 3, 3)),
        cla_w2=w((num_class, num_class * 10)), cla_b2=b(num_class),
    )


# --------------------------------- main ---------------------------------------

if __name__ == "__main__":
    band_num, H, W = 32, 8, 8
    num_class = 8
    B1 = (band_num - 7) // 2 + 1        # depth after spe1 (stride-2 (7,1,1) conv)
    B2 = (B1 - 7) // 2 + 1              # depth after spe3

    key = jax.random.PRNGKey(0)
    kx, kr, kp = jax.random.split(key, 3)
    inputx = jax.random.normal(kx, (1, band_num, H, W), jnp.float32)
    inputrgb = jax.random.normal(kr, (1, band_num, H, W), jnp.float32)
    params = init_params(kp, band_num, num_class, B1, B2)

    fwd = jax.jit(cnn_forward)
    outs = fwd(params, inputx, inputrgb)
    outs = jax.block_until_ready(outs)

    assert outs[0].shape == (1, num_class, H, W)
    assert outs[1].shape == (1, num_class, H, W)
    assert outs[3].shape == (1, num_class, H, W)
    assert all(bool(jnp.all(jnp.isfinite(o))) for o in outs)
    print("KERNEL_OK")
</pallas_src>

<mosaic_0001>
module attributes {stable_mosaic.version = 11 : i64} {
  func.func @_cnn_megakernel(%arg0: memref<32x64xf32, #tpu.memory_space<vmem>>, %arg1: memref<32x64xf32, #tpu.memory_space<vmem>>, %arg2: memref<52x32xbf16, #tpu.memory_space<vmem>>, %arg3: memref<208x52xbf16, #tpu.memory_space<vmem>>, %arg4: memref<52x208xbf16, #tpu.memory_space<vmem>>, %arg5: memref<52x52xbf16, #tpu.memory_space<vmem>>, %arg6: memref<64x52xbf16, #tpu.memory_space<vmem>>, %arg7: memref<32x64xbf16, #tpu.memory_space<vmem>>, %arg8: memref<64x32xbf16, #tpu.memory_space<vmem>>, %arg9: memref<64x64xbf16, #tpu.memory_space<vmem>>, %arg10: memref<16x64xbf16, #tpu.memory_space<vmem>>, %arg11: memref<32x16xbf16, #tpu.memory_space<vmem>>, %arg12: memref<8x32xbf16, #tpu.memory_space<vmem>>, %arg13: memref<16x32xbf16, #tpu.memory_space<vmem>>, %arg14: memref<8x16xbf16, #tpu.memory_space<vmem>>, %arg15: memref<3x8xbf16, #tpu.memory_space<vmem>>, %arg16: memref<8x3xbf16, #tpu.memory_space<vmem>>, %arg17: memref<80x144xbf16, #tpu.memory_space<vmem>>, %arg18: memref<8x80xbf16, #tpu.memory_space<vmem>>, %arg19: memref<64x64xbf16, #tpu.memory_space<vmem>>, %arg20: memref<64x64xbf16, #tpu.memory_space<vmem>>, %arg21: memref<576x64xbf16, #tpu.memory_space<vmem>>, %arg22: memref<680x1xf32, #tpu.memory_space<vmem>>, %arg23: memref<24x64xf32, #tpu.memory_space<vmem>>) attributes {dimension_semantics = [], scalar_prefetch = 0 : i64, scratch_operands = 0 : i64, tpu.core_type = #tpu.core_type<tc>} {
    %c0 = arith.constant 0 : index
    %c0_0 = arith.constant 0 : index
    %0 = vector.load %arg0[%c0, %c0_0] : memref<32x64xf32, #tpu.memory_space<vmem>>, vector<32x64xf32>
    %c0_1 = arith.constant 0 : index
    %c0_2 = arith.constant 0 : index
    %1 = vector.load %arg22[%c0_1, %c0_2] : memref<680x1xf32, #tpu.memory_space<vmem>>, vector<52x1xf32>
    %c0_3 = arith.constant 0 : index
    %c0_4 = arith.constant 0 : index
    %2 = vector.load %arg2[%c0_3, %c0_4] : memref<52x32xbf16, #tpu.memory_space<vmem>>, vector<52x32xbf16>
    %3 = arith.truncf %0 : vector<32x64xf32> to vector<32x64xbf16>
    %cst = arith.constant dense<0.000000e+00> : vector<52x64xf32>
    %4 = tpu.matmul %2, %3, %cst {dimension_numbers = #tpu.dot_dimension_numbers<[1], [0], [0], [1], [0, 0, 1, 1], [], []>} : vector<52x32xbf16>, vector<32x64xbf16>, vector<52x64xf32> -> vector<52x64xf32>
    %5 = vector.broadcast %1 : vector<52x1xf32> to vector<52x64xf32>
    %6 = arith.addf %4, %5 : vector<52x64xf32>
    %cst_5 = arith.constant 0.000000e+00 : f32
    %7 = vector.broadcast %cst_5 : f32 to vector<52x64xf32>
    %8 = arith.maximumf %6, %7 : vector<52x64xf32>
    %c56 = arith.constant 56 : index
    %c0_6 = arith.constant 0 : index
    %9 = vector.load %arg22[%c56, %c0_6] : memref<680x1xf32, #tpu.memory_space<vmem>>, vector<208x1xf32>
    %c0_7 = arith.constant 0 : index
    %c0_8 = arith.constant 0 : index
    %10 = vector.load %arg3[%c0_7, %c0_8] : memref<208x52xbf16, #tpu.memory_space<vmem>>, vector<208x52xbf16>
    %11 = arith.truncf %8 : vector<52x64xf32> to vector<52x64xbf16>
    %cst_9 = arith.constant dense<0.000000e+00> : vector<208x64xf32>
    %12 = tpu.matmul %10, %11, %cst_9 {dimension_numbers = #tpu.dot_dimension_numbers<[1], [0], [0], [1], [0, 0, 1, 1], [], []>} : vector<208x52xbf16>, vector<52x64xbf16>, vector<208x64xf32> -> vector<208x64xf32>
    %13 = vector.broadcast %9 : vector<208x1xf32> to vector<208x64xf32>
    %14 = arith.addf %12, %13 : vector<208x64xf32>
    %cst_10 = arith.constant 0.000000e+00 : f32
    %15 = vector.broadcast %cst_10 : f32 to vector<208x64xf32>
    %16 = arith.maximumf %14, %15 : vector<208x64xf32>
    %c264 = arith.constant 264 : index
    %c0_11 = arith.constant 0 : index
    %17 = vector.load %arg22[%c264, %c0_11] : memref<680x1xf32, #tpu.memory_space<vmem>>, vector<52x1xf32>
    %c0_12 = arith.constant 0 : index
    %c0_13 = arith.constant 0 : index
    %18 = vector.load %arg4[%c0_12, %c0_13] : memref<52x208xbf16, #tpu.memory_space<vmem>>, vector<52x208xbf16>
    %19 = arith.truncf %16 : vector<208x64xf32> to vector<208x64xbf16>
    %cst_14 = arith.constant dense<0.000000e+00> : vector<52x64xf32>
    %20 = tpu.matmul %18, %19, %cst_14 {dimension_numbers = #tpu.dot_dimension_numbers<[1], [0], [0], [1], [0, 0, 1, 1], [], []>} : vector<52x208xbf16>, vector<208x64xbf16>, vector<52x64xf32> -> vector<52x64xf32>
    %21 = vector.broadcast %17 : vector<52x1xf32> to vector<52x64xf32>
    %22 = arith.addf %20, %21 : vector<52x64xf32>
    %cst_15 = arith.constant 0.000000e+00 : f32
    %23 = vector.broadcast %cst_15 : f32 to vector<52x64xf32>
    %24 = arith.maximumf %22, %23 : vector<52x64xf32>
    %25 = arith.addf %24, %8 : vector<52x64xf32>
    %26 = arith.truncf %25 : vector<52x64xf32> to vector<52x64xbf16>
    %c0_16 = arith.constant 0 : index
    %c0_17 = arith.constant 0 : index
    %27 = vector.load %arg19[%c0_16, %c0_17] : memref<64x64xbf16, #tpu.memory_space<vmem>>, vector<64x64xbf16>
    %cst_18 = arith.constant dense<0.000000e+00> : vector<52x64xf32>
    %28 = tpu.matmul %26, %27, %cst_18 {dimension_numbers = #tpu.dot_dimension_numbers<[1], [0], [0], [1], [0, 0, 1, 1], [], []>} : vector<52x64xbf16>, vector<64x64xbf16>, vector<52x64xf32> -> vector<52x64xf32>
    %c320 = arith.constant 320 : index
    %c0_19 = arith.constant 0 : index
    %29 = vector.load %arg22[%c320, %c0_19] : memref<680x1xf32, #tpu.memory_space<vmem>>, vector<52x1xf32>
    %c0_20 = arith.constant 0 : index
    %c0_21 = arith.constant 0 : index
    %30 = vector.load %arg5[%c0_20, %c0_21] : memref<52x52xbf16, #tpu.memory_space<vmem>>, vector<52x52xbf16>
    %31 = arith.truncf %28 : vector<52x64xf32> to vector<52x64xbf16>
    %cst_22 = arith.constant dense<0.000000e+00> : vector<52x64xf32>
    %32 = tpu.matmul %30, %31, %cst_22 {dimension_numbers = #tpu.dot_dimension_numbers<[1], [0], [0], [1], [0, 0, 1, 1], [], []>} : vector<52x52xbf16>, vector<52x64xbf16>, vector<52x64xf32> -> vector<52x64xf32>
    %33 = vector.broadcast %29 : vector<52x1xf32> to vector<52x64xf32>
    %34 = arith.addf %32, %33 : vector<52x64xf32>
    %cst_23 = arith.constant 0.000000e+00 : f32
    %35 = vector.broadcast %cst_23 : f32 to vector<52x64xf32>
    %36 = arith.subf %35, %34 : vector<52x64xf32>
    %37 = math.exp %36 : vector<52x64xf32>
    %cst_24 = arith.constant 1.000000e+00 : f32
    %38 = vector.broadcast %cst_24 : f32 to vector<52x64xf32>
    %39 = arith.addf %38, %37 : vector<52x64xf32>
    %40 = tpu.reciprocal %39 {approx = true} : vector<52x64xf32> -> vector<52x64xf32>
    %41 = arith.mulf %40, %25 : vector<52x64xf32>
    %cst_25 = arith.constant 0.999994993 : f32
    %42 = vector.broadcast %cst_25 : f32 to vector<52x64xf32>
    %43 = arith.mulf %41, %42 : vector<52x64xf32>
    %cst_26 = arith.constant 0.000000e+00 : f32
    %44 = vector.broadcast %cst_26 : f32 to vector<52x64xf32>
    %45 = arith.maximumf %43, %44 : vector<52x64xf32>
    %46 = arith.addf %45, %25 : vector<52x64xf32>
    %c376 = arith.constant 376 : index
    %c0_27 = arith.constant 0 : index
    %47 = vector.load %arg22[%c376, %c0_27] : memref<680x1xf32, #tpu.memory_space<vmem>>, vector<64x1xf32>
    %c0_28 = arith.constant 0 : index
    %c0_29 = arith.constant 0 : index
    %48 = vector.load %arg6[%c0_28, %c0_29] : memref<64x52xbf16, #tpu.memory_space<vmem>>, vector<64x52xbf16>
    %49 = arith.truncf %46 : vector<52x64xf32> to vector<52x64xbf16>
    %cst_30 = arith.constant dense<0.000000e+00> : vector<64x64xf32>
    %50 = tpu.matmul %48, %49, %cst_30 {dimension_numbers = #tpu.dot_dimension_numbers<[1], [0], [0], [1], [0, 0, 1, 1], [], []>} : vector<64x52xbf16>, vector<52x64xbf16>, vector<64x64xf32> -> vector<64x64xf32>
    %51 = vector.broadcast %47 : vector<64x1xf32> to vector<64x64xf32>
    %52 = arith.addf %50, %51 : vector<64x64xf32>
    %cst_31 = arith.constant 0.000000e+00 : f32
    %53 = vector.broadcast %cst_31 : f32 to vector<64x64xf32>
    %54 = arith.maximumf %52, %53 : vector<64x64xf32>
    %c440 = arith.constant 440 : index
    %c0_32 = arith.constant 0 : index
    %55 = vector.load %arg22[%c440, %c0_32] : memref<680x1xf32, #tpu.memory_space<vmem>>, vector<32x1xf32>
    %c0_33 = arith.constant 0 : index
    %c0_34 = arith.constant 0 : index
    %56 = vector.load %arg7[%c0_33, %c0_34] : memref<32x64xbf16, #tpu.memory_space<vmem>>, vector<32x64xbf16>
    %57 = arith.truncf %54 : vector<64x64xf32> to vector<64x64xbf16>
    %cst_35 = arith.constant dense<0.000000e+00> : vector<32x64xf32>
    %58 = tpu.matmul %56, %57, %cst_35 {dimension_numbers = #tpu.dot_dimension_numbers<[1], [0], [0], [1], [0, 0, 1, 1], [], []>} : vector<32x64xbf16>, vector<64x64xbf16>, vector<32x64xf32> -> vector<32x64xf32>
    %59 = vector.broadcast %55 : vector<32x1xf32> to vector<32x64xf32>
    %60 = arith.addf %58, %59 : vector<32x64xf32>
    %cst_36 = arith.constant 0.000000e+00 : f32
    %61 = vector.broadcast %cst_36 : f32 to vector<32x64xf32>
    %62 = arith.maximumf %60, %61 : vector<32x64xf32>
    %c472 = arith.constant 472 : index
    %c0_37 = arith.constant 0 : index
    %63 = vector.load %arg22[%c472, %c0_37] : memref<680x1xf32, #tpu.memory_space<vmem>>, vector<64x1xf32>
    %c0_38 = arith.constant 0 : index
    %c0_39 = arith.constant 0 : index
    %64 = vector.load %arg8[%c0_38, %c0_39] : memref<64x32xbf16, #tpu.memory_space<vmem>>, vector<64x32xbf16>
    %65 = arith.truncf %62 : vector<32x64xf32> to vector<32x64xbf16>
    %cst_40 = arith.constant dense<0.000000e+00> : vector<64x64xf32>
    %66 = tpu.matmul %64, %65, %cst_40 {dimension_numbers = #tpu.dot_dimension_numbers<[1], [0], [0], [1], [0, 0, 1, 1], [], []>} : vector<64x32xbf16>, vector<32x64xbf16>, vector<64x64xf32> -> vector<64x64xf32>
    %67 = vector.broadcast %63 : vector<64x1xf32> to vector<64x64xf32>
    %68 = arith.addf %66, %67 : vector<64x64xf32>
    %cst_41 = arith.constant 0.000000e+00 : f32
    %69 = vector.broadcast %cst_41 : f32 to vector<64x64xf32>
    %70 = arith.maximumf %68, %69 : vector<64x64xf32>
    %71 = arith.addf %70, %54 : vector<64x64xf32>
    %72 = arith.truncf %71 : vector<64x64xf32> to vector<64x64xbf16>
    %c0_42 = arith.constant 0 : index
    %c0_43 = arith.constant 0 : index
    %73 = vector.load %arg19[%c0_42, %c0_43] : memref<64x64xbf16, #tpu.memory_space<vmem>>, vector<64x64xbf16>
    %cst_44 = arith.constant dense<0.000000e+00> : vector<64x64xf32>
    %74 = tpu.matmul %72, %73, %cst_44 {dimension_numbers = #tpu.dot_dimension_numbers<[1], [0], [0], [1], [0, 0, 1, 1], [], []>} : vector<64x64xbf16>, vector<64x64xbf16>, vector<64x64xf32> -> vector<64x64xf32>
    %c536 = arith.constant 536 : index
    %c0_45 = arith.constant 0 : index
    %75 = vector.load %arg22[%c536, %c0_45] : memref<680x1xf32, #tpu.memory_space<vmem>>, vector<64x1xf32>
    %c0_46 = arith.constant 0 : index
    %c0_47 = arith.constant 0 : index
    %76 = vector.load %arg9[%c0_46, %c0_47] : memref<64x64xbf16, #tpu.memory_space<vmem>>, vector<64x64xbf16>
    %77 = arith.truncf %74 : vector<64x64xf32> to vector<64x64xbf16>
    %cst_48 = arith.constant dense<0.000000e+00> : vector<64x64xf32>
    %78 = tpu.matmul %76, %77, %cst_48 {dimension_numbers = #tpu.dot_dimension_numbers<[1], [0], [0], [1], [0, 0, 1, 1], [], []>} : vector<64x64xbf16>, vector<64x64xbf16>, vector<64x64xf32> -> vector<64x64xf32>
    %79 = vector.broadcast %75 : vector<64x1xf32> to vector<64x64xf32>
    %80 = arith.addf %78, %79 : vector<64x64xf32>
    %cst_49 = arith.constant 0.000000e+00 : f32
    %81 = vector.broadcast %cst_49 : f32 to vector<64x64xf32>
    %82 = arith.subf %81, %80 : vector<64x64xf32>
    %83 = math.exp %82 : vector<64x64xf32>
    %cst_50 = arith.constant 1.000000e+00 : f32
    %84 = vector.broadcast %cst_50 : f32 to vector<64x64xf32>
    %85 = arith.addf %84, %83 : vector<64x64xf32>
    %86 = tpu.reciprocal %85 {approx = true} : vector<64x64xf32> -> vector<64x64xf32>
    %87 = arith.mulf %86, %71 : vector<64x64xf32>
    %cst_51 = arith.constant 0.999994993 : f32
    %88 = vector.broadcast %cst_51 : f32 to vector<64x64xf32>
    %89 = arith.mulf %87, %88 : vector<64x64xf32>
    %cst_52 = arith.constant 0.000000e+00 : f32
    %90 = vector.broadcast %cst_52 : f32 to vector<64x64xf32>
    %91 = arith.maximumf %89, %90 : vector<64x64xf32>
    %92 = arith.addf %91, %71 : vector<64x64xf32>
    %c600 = arith.constant 600 : index
    %c0_53 = arith.constant 0 : index
    %93 = vector.load %arg22[%c600, %c0_53] : memref<680x1xf32, #tpu.memory_space<vmem>>, vector<16x1xf32>
    %c0_54 = arith.constant 0 : index
    %c0_55 = arith.constant 0 : index
    %94 = vector.load %arg10[%c0_54, %c0_55] : memref<16x64xbf16, #tpu.memory_space<vmem>>, vector<16x64xbf16>
    %95 = arith.truncf %92 : vector<64x64xf32> to vector<64x64xbf16>
    %cst_56 = arith.constant dense<0.000000e+00> : vector<16x64xf32>
    %96 = tpu.matmul %94, %95, %cst_56 {dimension_numbers = #tpu.dot_dimension_numbers<[1], [0], [0], [1], [0, 0, 1, 1], [], []>} : vector<16x64xbf16>, vector<64x64xbf16>, vector<16x64xf32> -> vector<16x64xf32>
    %97 = vector.broadcast %93 : vector<16x1xf32> to vector<16x64xf32>
    %98 = arith.addf %96, %97 : vector<16x64xf32>
    %cst_57 = arith.constant 0.000000e+00 : f32
    %99 = vector.broadcast %cst_57 : f32 to vector<16x64xf32>
    %100 = arith.maximumf %98, %99 : vector<16x64xf32>
    %101 = arith.truncf %100 : vector<16x64xf32> to vector<16x64xbf16>
    %c0_58 = arith.constant 0 : index
    %c0_59 = arith.constant 0 : index
    %102 = vector.load %arg20[%c0_58, %c0_59] : memref<64x64xbf16, #tpu.memory_space<vmem>>, vector<64x64xbf16>
    %cst_60 = arith.constant dense<0.000000e+00> : vector<16x64xf32>
    %103 = tpu.matmul %101, %102, %cst_60 {dimension_numbers = #tpu.dot_dimension_numbers<[1], [0], [0], [1], [0, 0, 1, 1], [], []>} : vector<16x64xbf16>, vector<64x64xbf16>, vector<16x64xf32> -> vector<16x64xf32>
    %c616 = arith.constant 616 : index
    %c0_61 = arith.constant 0 : index
    %104 = vector.load %arg22[%c616, %c0_61] : memref<680x1xf32, #tpu.memory_space<vmem>>, vector<32x1xf32>
    %c0_62 = arith.constant 0 : index
    %c0_63 = arith.constant 0 : index
    %105 = vector.load %arg11[%c0_62, %c0_63] : memref<32x16xbf16, #tpu.memory_space<vmem>>, vector<32x16xbf16>
    %106 = arith.truncf %103 : vector<16x64xf32> to vector<16x64xbf16>
    %cst_64 = arith.constant dense<0.000000e+00> : vector<32x64xf32>
    %107 = tpu.matmul %105, %106, %cst_64 {dimension_numbers = #tpu.dot_dimension_numbers<[1], [0], [0], [1], [0, 0, 1, 1], [], []>} : vector<32x16xbf16>, vector<16x64xbf16>, vector<32x64xf32> -> vector<32x64xf32>
    %108 = vector.broadcast %104 : vector<32x1xf32> to vector<32x64xf32>
    %109 = arith.addf %107, %108 : vector<32x64xf32>
    %cst_65 = arith.constant 0.000000e+00 : f32
    %110 = vector.broadcast %cst_65 : f32 to vector<32x64xf32>
    %111 = arith.maximumf %109, %110 : vector<32x64xf32>
    %c648 = arith.constant 648 : index
    %c0_66 = arith.constant 0 : index
    %112 = vector.load %arg22[%c648, %c0_66] : memref<680x1xf32, #tpu.memory_space<vmem>>, vector<8x1xf32>
    %c0_67 = arith.constant 0 : index
    %c0_68 = arith.constant 0 : index
    %113 = vector.load %arg12[%c0_67, %c0_68] : memref<8x32xbf16, #tpu.memory_space<vmem>>, vector<8x32xbf16>
    %114 = arith.truncf %111 : vector<32x64xf32> to vector<32x64xbf16>
    %cst_69 = arith.constant dense<0.000000e+00> : vector<8x64xf32>
    %115 = tpu.matmul %113, %114, %cst_69 {dimension_numbers = #tpu.dot_dimension_numbers<[1], [0], [0], [1], [0, 0, 1, 1], [], []>} : vector<8x32xbf16>, vector<32x64xbf16>, vector<8x64xf32> -> vector<8x64xf32>
    %116 = vector.broadcast %112 : vector<8x1xf32> to vector<8x64xf32>
    %117 = arith.addf %115, %116 : vector<8x64xf32>
    %c0_70 = arith.constant 0 : index
    %c0_71 = arith.constant 0 : index
    %118 = vector.load %arg1[%c0_70, %c0_71] : memref<32x64xf32, #tpu.memory_space<vmem>>, vector<32x64xf32>
    %c0_72 = arith.constant 0 : index
    %c0_73 = arith.constant 0 : index
    %119 = vector.load %arg13[%c0_72, %c0_73] : memref<16x32xbf16, #tpu.memory_space<vmem>>, vector<16x32xbf16>
    %120 = arith.truncf %118 : vector<32x64xf32> to vector<32x64xbf16>
    %cst_74 = arith.constant dense<0.000000e+00> : vector<16x64xf32>
    %121 = tpu.matmul %119, %120, %cst_74 {dimension_numbers = #tpu.dot_dimension_numbers<[1], [0], [0], [1], [0, 0, 1, 1], [], []>} : vector<16x32xbf16>, vector<32x64xbf16>, vector<16x64xf32> -> vector<16x64xf32>
    %cst_75 = arith.constant 0.000000e+00 : f32
    %122 = vector.broadcast %cst_75 : f32 to vector<16x64xf32>
    %123 = arith.maximumf %121, %122 : vector<16x64xf32>
    %c0_76 = arith.constant 0 : index
    %c0_77 = arith.constant 0 : index
    %124 = vector.load %arg14[%c0_76, %c0_77] : memref<8x16xbf16, #tpu.memory_space<vmem>>, vector<8x16xbf16>
    %125 = arith.truncf %123 : vector<16x64xf32> to vector<16x64xbf16>
    %cst_78 = arith.constant dense<0.000000e+00> : vector<8x64xf32>
    %126 = tpu.matmul %124, %125, %cst_78 {dimension_numbers = #tpu.dot_dimension_numbers<[1], [0], [0], [1], [0, 0, 1, 1], [], []>} : vector<8x16xbf16>, vector<16x64xbf16>, vector<8x64xf32> -> vector<8x64xf32>
    %cst_79 = arith.constant 0.000000e+00 : f32
    %127 = vector.broadcast %cst_79 : f32 to vector<8x64xf32>
    %128 = arith.maximumf %126, %127 : vector<8x64xf32>
    %c656 = arith.constant 656 : index
    %c0_80 = arith.constant 0 : index
    %129 = vector.load %arg22[%c656, %c0_80] : memref<680x1xf32, #tpu.memory_space<vmem>>, vector<3x1xf32>
    %c0_81 = arith.constant 0 : index
    %c0_82 = arith.constant 0 : index
    %130 = vector.load %arg15[%c0_81, %c0_82] : memref<3x8xbf16, #tpu.memory_space<vmem>>, vector<3x8xbf16>
    %131 = arith.truncf %128 : vector<8x64xf32> to vector<8x64xbf16>
    %cst_83 = arith.constant dense<0.000000e+00> : vector<3x64xf32>
    %132 = tpu.matmul %130, %131, %cst_83 {dimension_numbers = #tpu.dot_dimension_numbers<[1], [0], [0], [1], [0, 0, 1, 1], [], []>} : vector<3x8xbf16>, vector<8x64xbf16>, vector<3x64xf32> -> vector<3x64xf32>
    %133 = vector.broadcast %129 : vector<3x1xf32> to vector<3x64xf32>
    %134 = arith.addf %132, %133 : vector<3x64xf32>
    %cst_84 = arith.constant 0.000000e+00 : f32
    %135 = vector.broadcast %cst_84 : f32 to vector<3x64xf32>
    %136 = arith.maximumf %134, %135 : vector<3x64xf32>
    %c664 = arith.constant 664 : index
    %c0_85 = arith.constant 0 : index
    %137 = vector.load %arg22[%c664, %c0_85] : memref<680x1xf32, #tpu.memory_space<vmem>>, vector<8x1xf32>
    %c0_86 = arith.constant 0 : index
    %c0_87 = arith.constant 0 : index
    %138 = vector.load %arg16[%c0_86, %c0_87] : memref<8x3xbf16, #tpu.memory_space<vmem>>, vector<8x3xbf16>
    %139 = arith.truncf %136 : vector<3x64xf32> to vector<3x64xbf16>
    %cst_88 = arith.constant dense<0.000000e+00> : vector<8x64xf32>
    %140 = tpu.matmul %138, %139, %cst_88 {dimension_numbers = #tpu.dot_dimension_numbers<[1], [0], [0], [1], [0, 0, 1, 1], [], []>} : vector<8x3xbf16>, vector<3x64xbf16>, vector<8x64xf32> -> vector<8x64xf32>
    %141 = vector.broadcast %137 : vector<8x1xf32> to vector<8x64xf32>
    %142 = arith.addf %140, %141 : vector<8x64xf32>
    %143 = tpu.concatenate %117, %142 in 0 : vector<8x64xf32>, vector<8x64xf32> -> vector<16x64xf32>
    %144 = arith.truncf %143 : vector<16x64xf32> to vector<16x64xbf16>
    %c0_89 = arith.constant 0 : index
    %c0_90 = arith.constant 0 : index
    %145 = vector.load %arg21[%c0_89, %c0_90] : memref<576x64xbf16, #tpu.memory_space<vmem>>, vector<64x64xbf16>
    %cst_91 = arith.constant dense<0.000000e+00> : vector<16x64xf32>
    %146 = tpu.matmul %144, %145, %cst_91 {dimension_numbers = #tpu.dot_dimension_numbers<[1], [0], [0], [1], [0, 0, 1, 1], [], []>} : vector<16x64xbf16>, vector<64x64xbf16>, vector<16x64xf32> -> vector<16x64xf32>
    %147 = arith.truncf %146 : vector<16x64xf32> to vector<16x64xbf16>
    %c64 = arith.constant 64 : index
    %c0_92 = arith.constant 0 : index
    %148 = vector.load %arg21[%c64, %c0_92] : memref<576x64xbf16, #tpu.memory_space<vmem>>, vector<64x64xbf16>
    %cst_93 = arith.constant dense<0.000000e+00> : vector<16x64xf32>
    %149 = tpu.matmul %144, %148, %cst_93 {dimension_numbers = #tpu.dot_dimension_numbers<[1], [0], [0], [1], [0, 0, 1, 1], [], []>} : vector<16x64xbf16>, vector<64x64xbf16>, vector<16x64xf32> -> vector<16x64xf32>
    %150 = arith.truncf %149 : vector<16x64xf32> to vector<16x64xbf16>
    %c128 = arith.constant 128 : index
    %c0_94 = arith.constant 0 : index
    %151 = vector.load %arg21[%c128, %c0_94] : memref<576x64xbf16, #tpu.memory_space<vmem>>, vector<64x64xbf16>
    %cst_95 = arith.constant dense<0.000000e+00> : vector<16x64xf32>
    %152 = tpu.matmul %144, %151, %cst_95 {dimension_numbers = #tpu.dot_dimension_numbers<[1], [0], [0], [1], [0, 0, 1, 1], [], []>} : vector<16x64xbf16>, vector<64x64xbf16>, vector<16x64xf32> -> vector<16x64xf32>
    %153 = arith.truncf %152 : vector<16x64xf32> to vector<16x64xbf16>
    %c192 = arith.constant 192 : index
    %c0_96 = arith.constant 0 : index
    %154 = vector.load %arg21[%c192, %c0_96] : memref<576x64xbf16, #tpu.memory_space<vmem>>, vector<64x64xbf16>
    %cst_97 = arith.constant dense<0.000000e+00> : vector<16x64xf32>
    %155 = tpu.matmul %144, %154, %cst_97 {dimension_numbers = #tpu.dot_dimension_numbers<[1], [0], [0], [1], [0, 0, 1, 1], [], []>} : vector<16x64xbf16>, vector<64x64xbf16>, vector<16x64xf32> -> vector<16x64xf32>
    %156 = arith.truncf %155 : vector<16x64xf32> to vector<16x64xbf16>
    %c256 = arith.constant 256 : index
    %c0_98 = arith.constant 0 : index
    %157 = vector.load %arg21[%c256, %c0_98] : memref<576x64xbf16, #tpu.memory_space<vmem>>, vector<64x64xbf16>
    %cst_99 = arith.constant dense<0.000000e+00> : vector<16x64xf32>
    %158 = tpu.matmul %144, %157, %cst_99 {dimension_numbers = #tpu.dot_dimension_numbers<[1], [0], [0], [1], [0, 0, 1, 1], [], []>} : vector<16x64xbf16>, vector<64x64xbf16>, vector<16x64xf32> -> vector<16x64xf32>
    %159 = arith.truncf %158 : vector<16x64xf32> to vector<16x64xbf16>
    %c320_100 = arith.constant 320 : index
    %c0_101 = arith.constant 0 : index
    %160 = vector.load %arg21[%c320_100, %c0_101] : memref<576x64xbf16, #tpu.memory_space<vmem>>, vector<64x64xbf16>
    %cst_102 = arith.constant dense<0.000000e+00> : vector<16x64xf32>
    %161 = tpu.matmul %144, %160, %cst_102 {dimension_numbers = #tpu.dot_dimension_numbers<[1], [0], [0], [1], [0, 0, 1, 1], [], []>} : vector<16x64xbf16>, vector<64x64xbf16>, vector<16x64xf32> -> vector<16x64xf32>
    %162 = arith.truncf %161 : vector<16x64xf32> to vector<16x64xbf16>
    %c384 = arith.constant 384 : index
    %c0_103 = arith.constant 0 : index
    %163 = vector.load %arg21[%c384, %c0_103] : memref<576x64xbf16, #tpu.memory_space<vmem>>, vector<64x64xbf16>
    %cst_104 = arith.constant dense<0.000000e+00> : vector<16x64xf32>
    %164 = tpu.matmul %144, %163, %cst_104 {dimension_numbers = #tpu.dot_dimension_numbers<[1], [0], [0], [1], [0, 0, 1, 1], [], []>} : vector<16x64xbf16>, vector<64x64xbf16>, vector<16x64xf32> -> vector<16x64xf32>
    %165 = arith.truncf %164 : vector<16x64xf32> to vector<16x64xbf16>
    %c448 = arith.constant 448 : index
    %c0_105 = arith.constant 0 : index
    %166 = vector.load %arg21[%c448, %c0_105] : memref<576x64xbf16, #tpu.memory_space<vmem>>, vector<64x64xbf16>
    %cst_106 = arith.constant dense<0.000000e+00> : vector<16x64xf32>
    %167 = tpu.matmul %144, %166, %cst_106 {dimension_numbers = #tpu.dot_dimension_numbers<[1], [0], [0], [1], [0, 0, 1, 1], [], []>} : vector<16x64xbf16>, vector<64x64xbf16>, vector<16x64xf32> -> vector<16x64xf32>
    %168 = arith.truncf %167 : vector<16x64xf32> to vector<16x64xbf16>
    %c512 = arith.constant 512 : index
    %c0_107 = arith.constant 0 : index
    %169 = vector.load %arg21[%c512, %c0_107] : memref<576x64xbf16, #tpu.memory_space<vmem>>, vector<64x64xbf16>
    %cst_108 = arith.constant dense<0.000000e+00> : vector<16x64xf32>
    %170 = tpu.matmul %144, %169, %cst_108 {dimension_numbers = #tpu.dot_dimension_numbers<[1], [0], [0], [1], [0, 0, 1, 1], [], []>} : vector<16x64xbf16>, vector<64x64xbf16>, vector<16x64xf32> -> vector<16x64xf32>
    %171 = arith.truncf %170 : vector<16x64xf32> to vector<16x64xbf16>
    %172 = tpu.concatenate %147, %150, %153, %156, %159, %162, %165, %168, %171 in 0 : vector<16x64xbf16>, vector<16x64xbf16>, vector<16x64xbf16>, vector<16x64xbf16>, vector<16x64xbf16>, vector<16x64xbf16>, vector<16x64xbf16>, vector<16x64xbf16>, vector<16x64xbf16> -> vector<144x64xbf16>
    %c0_109 = arith.constant 0 : index
    %c0_110 = arith.constant 0 : index
    %173 = vector.load %arg17[%c0_109, %c0_110] : memref<80x144xbf16, #tpu.memory_space<vmem>>, vector<80x144xbf16>
    %cst_111 = arith.constant dense<0.000000e+00> : vector<80x64xf32>
    %174 = tpu.matmul %173, %172, %cst_111 {dimension_numbers = #tpu.dot_dimension_numbers<[1], [0], [0], [1], [0, 0, 1, 1], [], []>} : vector<80x144xbf16>, vector<144x64xbf16>, vector<80x64xf32> -> vector<80x64xf32>
    %cst_112 = arith.constant 0.000000e+00 : f32
    %175 = vector.broadcast %cst_112 : f32 to vector<80x64xf32>
    %176 = arith.maximumf %174, %175 : vector<80x64xf32>
    %c672 = arith.constant 672 : index
    %c0_113 = arith.constant 0 : index
    %177 = vector.load %arg22[%c672, %c0_113] : memref<680x1xf32, #tpu.memory_space<vmem>>, vector<8x1xf32>
    %c0_114 = arith.constant 0 : index
    %c0_115 = arith.constant 0 : index
    %178 = vector.load %arg18[%c0_114, %c0_115] : memref<8x80xbf16, #tpu.memory_space<vmem>>, vector<8x80xbf16>
    %179 = arith.truncf %176 : vector<80x64xf32> to vector<80x64xbf16>
    %cst_116 = arith.constant dense<0.000000e+00> : vector<8x64xf32>
    %180 = tpu.matmul %178, %179, %cst_116 {dimension_numbers = #tpu.dot_dimension_numbers<[1], [0], [0], [1], [0, 0, 1, 1], [], []>} : vector<8x80xbf16>, vector<80x64xbf16>, vector<8x64xf32> -> vector<8x64xf32>
    %181 = vector.broadcast %177 : vector<8x1xf32> to vector<8x64xf32>
    %182 = arith.addf %180, %181 : vector<8x64xf32>
    %183 = tpu.concatenate %117, %142, %182 in 0 : vector<8x64xf32>, vector<8x64xf32>, vector<8x64xf32> -> vector<24x64xf32>
    %c0_117 = arith.constant 0 : index
    %c0_118 = arith.constant 0 : index
    %184 = vector.load %arg23[%c0_117, %c0_118] : memref<24x64xf32, #tpu.memory_space<vmem>>, vector<24x64xf32>
    tpu.vector_store %arg23[%c0_117, %c0_118], %183 {strides = array<i32>} : memref<24x64xf32, #tpu.memory_space<vmem>>, vector<24x64xf32>,
    return
  }
}

</mosaic_0001>

<bundles_post_ra>
// kernel: mul.122
= control target key start
LH: loop header
LB: loop body
LE: loop exit
PB: predicated region body
PF: predicated region fallthrough
CT: control target
= control target key end

     0   :  { %vm3_vm0 = vcmask 105472   ;;  %s171_s8 = smov 102   ;;  %s172_s9 = smov 115   ;;  %s254_s0 = inlined_call_operand.vmem [shape: f32[52,13], index: 0, kind: input, shape index: {}]   ;;  %s255_s1 = inlined_call_operand.vmem [shape: f32[4,13,13], index: 1, kind: output, shape index: {}]  }
   0x1   :  { %v30_v0 = vld [vmem:[%s254_s0] sm:$0xff]   ;;  %v154_v1 = vld [vmem:[%s254_s0 + $0x8] sm:$0x1f]  }
   0x2   :  { %31 = vrot.lane.b32.xlu1 %v30_v0, %s171_s8  ;;  %14 = vrot.lane.b32.xlu0 %v30_v0, %s172_s9  ;;  %4 = vst.msk [vmem:[#allocation0] ss:$8 sm:$0xf] %vm3_vm0, %v30_v0   ;;  %5 = vst.msk [vmem:[#allocation0] ss:$8 sm:$0xf0] %vm3_vm0, %v30_v0  }
   0x3   :  { %v153_v2 = vld [vmem:[%s254_s0 + $0x8] sm:$0x1f]  }
   0x4   :  { %v152_v3 = vld [vmem:[%s254_s0 + $0x8] sm:$0x1f]  }
   0x5   :  { %10 = vst.msk [vmem:[#allocation0 + $0x40] ss:$8 sm:$0xf] %vm3_vm0, %v152_v3   ;;  %12 = vst.msk [vmem:[#allocation0 + $0x5c] sm:$0x10] %vm3_vm0, %v152_v3  }
   0x6   :  { %40 = vrot.lane.b32.xlu1 %v154_v1, %s171_s8  ;;  %23 = vrot.lane.b32.xlu0 %v153_v2, %s172_s9  ;;  %v155_v4 = vld [vmem:[%s254_s0 + $0x8] sm:$0x1f]   ;;  %s173_s0 = smov 89  }
   0xa   :  { %57 = vrot.lane.b32.xlu1 %v155_v4, %s173_s0  ;;  %48 = vrot.lane.b32.xlu0 %v30_v0, %s173_s0 }
  0x74   :  { %v32_v5 = vpop.permute.xlu1 %31   ;;  %v15_v6 = vpop.permute.xlu0 %14  }
  0x75   :  { %35 = vst.msk [vmem:[#allocation0 + $0x2] ss:$8 sm:$0xf] %vm3_vm0, %v32_v5   ;;  %37 = vst.msk [vmem:[#allocation0 + $0x2] ss:$8 sm:$0xf0] %vm3_vm0, %v32_v5  }
  0x76   :  { %18 = vst.msk [vmem:[#allocation0 + $0x1] ss:$8 sm:$0xf] %vm3_vm0, %v15_v6   ;;  %20 = vst.msk [vmem:[#allocation0 + $0x1] ss:$8 sm:$0xf0] %vm3_vm0, %v15_v6  }
  0x78   :  { %v41_v7 = vpop.permute.xlu1 %40   ;;  %v24_v8 = vpop.permute.xlu0 %23  }
  0x79   :  { %44 = vst.msk [vmem:[#allocation0 + $0x42] ss:$8 sm:$0xf] %vm3_vm0, %v41_v7   ;;  %46 = vst.msk [vmem:[#allocation0 + $0x5e] sm:$0x10] %vm3_vm0, %v41_v7  }
  0x7a   :  { %27 = vst.msk [vmem:[#allocation0 + $0x41] ss:$8 sm:$0xf] %vm3_vm0, %v24_v8   ;;  %29 = vst.msk [vmem:[#allocation0 + $0x5d] sm:$0x10] %vm3_vm0, %v24_v8  }
  0x7c   :  { %v58_v9 = vpop.permute.xlu1 %57   ;;  %v49_v10 = vpop.permute.xlu0 %48  }
  0x7d   :  { %61 = vst.msk [vmem:[#allocation0 + $0x43] ss:$8 sm:$0xf] %vm3_vm0, %v58_v9   ;;  %63 = vst.msk [vmem:[#allocation0 + $0x5f] sm:$0x10] %vm3_vm0, %v58_v9  }
  0x7e   :  { %52 = vst.msk [vmem:[#allocation0 + $0x3] ss:$8 sm:$0xf] %vm3_vm0, %v49_v10   ;;  %54 = vst.msk [vmem:[#allocation0 + $0x3] ss:$8 sm:$0xf0] %vm3_vm0, %v49_v10  }
  0x84   :  { %v112_v11 = vld [vmem:[#allocation0 + $0x40] sm:$0xf]  ;;  %v118_v12 = vld [vmem:[#allocation0 + $0x48] sm:$0xf]  ;;  %v124_v13 = vld [vmem:[#allocation0 + $0x50] sm:$0xf] }
  0x85   :  { %163 = vst [vmem:[%s255_s1 + $0x20] sm:$0xf] %v112_v11  ;;  %164 = vst [vmem:[%s255_s1 + $0x24] sm:$0xf] %v118_v12  ;;  %v130_v14 = vld [vmem:[#allocation0 + $0x58] sm:$0xf] }
  0x86   :  { %165 = vst [vmem:[%s255_s1 + $0x28] sm:$0xf] %v124_v13  ;;  %v136_v15 = vld [vmem:[#allocation0 + $0x60] sm:$0xf]  ;;  %166 = vst [vmem:[%s255_s1 + $0x2c] sm:$0xf] %v130_v14 }
  0x87   :  { %v67_v16 = vld [vmem:[#allocation0] sm:$0xf]  ;;  %167 = vst [vmem:[%s255_s1 + $0x30] sm:$0xf] %v136_v15  ;;  %v71_v17 = vld [vmem:[#allocation0 + $0x8] sm:$0xf] }
  0x88   :  { %69 = vst [vmem:[%s255_s1] sm:$0xf] %v67_v16  ;;  %v76_v18 = vld [vmem:[#allocation0 + $0x10] sm:$0xf]  ;;  %v82_v19 = vld [vmem:[#allocation0 + $0x18] sm:$0xf] }
  0x89   :  { %156 = vst [vmem:[%s255_s1 + $0x4] sm:$0xf] %v71_v17  ;;  %157 = vst [vmem:[%s255_s1 + $0x8] sm:$0xf] %v76_v18  ;;  %v88_v20 = vld [vmem:[#allocation0 + $0x20] sm:$0xf] }
  0x8a   :  { %158 = vst [vmem:[%s255_s1 + $0xc] sm:$0xf] %v82_v19  ;;  %v94_v21 = vld [vmem:[#allocation0 + $0x28] sm:$0xf]  ;;  %v100_v22 = vld [vmem:[#allocation0 + $0x30] sm:$0xf] }
  0x8b   :  { %159 = vst [vmem:[%s255_s1 + $0x10] sm:$0xf] %v88_v20  ;;  %160 = vst [vmem:[%s255_s1 + $0x14] sm:$0xf] %v94_v21  ;;  %v106_v23 = vld [vmem:[#allocation0 + $0x38] sm:$0xf] }
  0x8c   :  { %161 = vst [vmem:[%s255_s1 + $0x18] sm:$0xf] %v100_v22  ;;  %162 = vst [vmem:[%s255_s1 + $0x1c] sm:$0xf] %v106_v23 }

// kernel: cnn_forward.1
= control target key start
LH: loop header
LB: loop body
LE: loop exit
PB: predicated region body
PF: predicated region fallthrough
CT: control target
= control target key end

     0   :  { %v4216_v0 = vmov 0   ;;  %vm148_vm0 = vcmask 261120   ;;  %vm4218_vm1 = vmmov 0   ;;  %vm523_vm2 = vcmask 1041408   ;;  %s5365_s22 = inlined_call_operand.vmem [shape: f32[680,1], index: 22, kind: input, shape index: {}]   ;;  %s5366_s0 = inlined_call_operand.vmem [shape: f32[32,64], index: 0, kind: input, shape index: {}]   ;;  %s5367_s2 = inlined_call_operand.vmem [shape: bf16[52,32], index: 2, kind: input, shape index: {}]   ;;  %s5368_s3 = inlined_call_operand.vmem [shape: bf16[208,52], index: 3, kind: input, shape index: {}]   ;;  %s5369_s4 = inlined_call_operand.vmem [shape: bf16[52,208], index: 4, kind: input, shape index: {}]   ;;  %s5370_s19 = inlined_call_operand.vmem [shape: bf16[64,64], index: 19, kind: input, shape index: {}]   ;;  %s5371_s5 = inlined_call_operand.vmem [shape: bf16[52,52], index: 5, kind: input, shape index: {}]   ;;  %s5372_s6 = inlined_call_operand.vmem [shape: bf16[64,52], index: 6, kind: input, shape index: {}]   ;;  %s5373_s7 = inlined_call_operand.vmem [shape: bf16[32,64], index: 7, kind: input, shape index: {}]   ;;  %s5374_s8 = inlined_call_operand.vmem [shape: bf16[64,32], index: 8, kind: input, shape index: {}]   ;;  %s5375_s9 = inlined_call_operand.vmem [shape: bf16[64,64], index: 9, kind: input, shape index: {}]   ;;  %s5376_s10 = inlined_call_operand.vmem [shape: bf16[16,64], index: 10, kind: input, shape index: {}]   ;;  %s5377_s20 = inlined_call_operand.vmem [shape: bf16[64,64], index: 20, kind: input, shape index: {}]   ;;  %s5378_s11 = inlined_call_operand.vmem [shape: bf16[32,16], index: 11, kind: input, shape index: {}]   ;;  %s5379_s1 = inlined_call_operand.vmem [shape: f32[32,64], index: 1, kind: input, shape index: {}]   ;;  %s5380_s13 = inlined_call_operand.vmem [shape: bf16[16,32], index: 13, kind: input, shape index: {}]   ;;  %s5381_s12 = inlined_call_operand.vmem [shape: bf16[8,32], index: 12, kind: input, shape index: {}]   ;;  %s5382_s14 = inlined_call_operand.vmem [shape: bf16[8,16], index: 14, kind: input, shape index: {}]   ;;  %s5383_s23 = inlined_call_operand.vmem [shape: f32[24,64], index: 23, kind: output, shape index: {}]   ;;  %s5384_s15 = inlined_call_operand.vmem [shape: bf16[3,8], index: 15, kind: input, shape index: {}]   ;;  %s5385_s21 = inlined_call_operand.vmem [shape: bf16[576,64], index: 21, kind: input, shape index: {}]   ;;  %s5386_s16 = inlined_call_operand.vmem [shape: bf16[8,3], index: 16, kind: input, shape index: {}]   ;;  %s5387_s17 = inlined_call_operand.vmem [shape: bf16[80,144], index: 17, kind: input, shape index: {}]   ;;  %s5388_s18 = inlined_call_operand.vmem [shape: bf16[8,80], index: 18, kind: input, shape index: {}]  }
   0x1   :  { %5397 = sst [smem:[#allocation2_spill]] %s5365_s22  ;;  %4046 = vset.pattern.permute.xlu1 %v4216_v0  ;;  %4045 = vset.pattern.permute.xlu0 %v4216_v0  ;;  %vm483_vm3 = vcmask 424960   ;;  %vm785_vm4 = vcmask 654336   ;;  %vm912_vm5 = vcmask 523264   ;;  %vm2137_vm6 = vcmask 130048  }
   0x2   :  { %5398 = sst [smem:[#allocation3_spill]] %s5366_s0  ;;  %s5405_s24 = sld [smem:[#allocation2_spill]]  ;;  %vm2366_vm7 = vcmask 1043456   ;;  %vm2362_vm8 = vcmask 64512   ;;  %vm2423_vm9 = vcmask 1040384   ;;  %vm2419_vm10 = vcmask 23552  }
   0x3   :  { %5399 = sst [smem:[#allocation4_spill]] %s5367_s2  ;;  %s5406_s2 = sld [smem:[#allocation3_spill]] }
   0x4   :  { %5400 = sst [smem:[#allocation5_spill]] %s5368_s3  ;;  %s5407_s26 = sld [smem:[#allocation4_spill]] }
   0x5   :  { %5401 = sst [smem:[#allocation6_spill]] %s5369_s4 }
   0x6   :  { %5402 = sst [smem:[#allocation7_spill]] %s5370_s19 }
   0x7   :  { %5403 = sst [smem:[#allocation8_spill]] %s5371_s5 }
   0x8   :  { %5404 = sst [smem:[#allocation9_spill]] %s5372_s6  ;;  %v81_v1 = vld [vmem:[%s5405_s24 + $0x10] sm:$0xff]  ;;  %v79_v2 = vld [vmem:[%s5405_s24] sm:$0xff]  ;;  %v82_v6 = vld [vmem:[%s5405_s24 + $0x18] sm:$0xff]  ;;  %s5410_s6 = sld [smem:[#allocation7_spill]] }
   0x9   :  { %v75_v3 = vld [vmem:[%s5406_s2] sm:$0xff]  ;;  %107 = vperm.xlu1 %4046, %v81_v1   ;;  %97 = vperm.xlu0 %4045, %v79_v2   ;;  %v76_v4 = vld [vmem:[%s5406_s2 + $0x8] sm:$0xff]  ;;  %v77_v7 = vld [vmem:[%s5406_s2 + $0x10] sm:$0xff]  ;;  %v4217_v2 = vmov 0.0   ;;  %s5411_s30 = sld [smem:[#allocation8_spill]]  ;;  %s5412_s29 = sld [smem:[#allocation9_spill]] }
   0xa   :  { %v93_v5 = vpack.c.bf16 %v76_v4, %v75_v3  ;;  %v78_v8 = vld [vmem:[%s5406_s2 + $0x18] sm:$0xff]  ;;  %v80_v9 = vld [vmem:[%s5405_s24 + $0x8] sm:$0xff]  ;;  %v4047_v11 = vld [vmem:[%s5407_s26] sm:$0xff]   ;;  %3689 = vmatprep.subr.bf16.mxu1 %v4217_v2  ;;  %3697 = vmatprep.mubr.msk.bf16.mxu1 %vm4218_vm1, %v4217_v2  ;;  %s5408_s2 = sld [smem:[#allocation5_spill]] }
   0xb   :  { %v94_v10 = vpack.c.bf16 %v78_v8, %v77_v7  ;;  %v84_v12 = vld [vmem:[%s5405_s24 + $0x28] sm:$0xff]  ;;  %v83_v13 = vld [vmem:[%s5405_s24 + $0x20] sm:$0xff]  ;;  %3681 = vmatprep.mubr.msk.bf16.mxu0 %vm148_vm0, %v4047_v11  ;;  %v4049_v15 = vld [vmem:[%s5407_s26 + $0x10] sm:$0xff]  }
   0xc   :  { %3677 = vmatprep.subr.bf16.mxu0 %v93_v5  ;;  %v4048_v14 = vld [vmem:[%s5407_s26 + $0x8] sm:$0xff]   ;;  %v232_v16 = vld [vmem:[%s5405_s24 + $0x38] sm:$0xff]  ;;  %v85_v17 = vld [vmem:[%s5405_s24 + $0x30] sm:$0xf] }
   0xd   :  { %3678 = vmatpush3.bf16.msra.mxu0 %v93_v5  ;;  %112 = vperm.xlu1 %4046, %v82_v6   ;;  %v234_v18 = vld [vmem:[%s5405_s24 + $0x48] sm:$0xff]  ;;  %v233_v19 = vld [vmem:[%s5405_s24 + $0x40] sm:$0xff]  ;;  %v4050_v20 = vld [vmem:[%s5407_s26 + $0x18] ss:$0 sps:$4 sm:$0x33]  }
   0xe   :  { %102 = vperm.xlu0 %4045, %v80_v9   ;;  %3679 = vmatprep.subr.bf16.mxu0 %v94_v10  ;;  %v236_v21 = vld [vmem:[%s5405_s24 + $0x58] sm:$0xff]  ;;  %v235_v22 = vld [vmem:[%s5405_s24 + $0x50] sm:$0xff]  ;;  %v238_v23 = vld [vmem:[%s5405_s24 + $0x68] sm:$0xff] }
   0xf   :  { %v237_v24 = vld [vmem:[%s5405_s24 + $0x60] sm:$0xff]  ;;  %v240_v25 = vld [vmem:[%s5405_s24 + $0x78] sm:$0xff]  ;;  %v239_v26 = vld [vmem:[%s5405_s24 + $0x70] sm:$0xff] }
  0x10   :  { %v242_v27 = vld [vmem:[%s5405_s24 + $0x88] sm:$0xff]  ;;  %v241_v28 = vld [vmem:[%s5405_s24 + $0x80] sm:$0xff]  ;;  %v244_v29 = vld [vmem:[%s5405_s24 + $0x98] sm:$0xff] }
  0x11   :  { %3680 = vmatpush3.bf16.msra.mxu0 %v94_v10  ;;  %122 = vperm.xlu1 %4046, %v84_v12   ;;  %v243_v30 = vld [vmem:[%s5405_s24 + $0x90] sm:$0xff]  ;;  %v246_v31 = vld [vmem:[%s5405_s24 + $0xa8] sm:$0xff]  ;;  %v245_v32 = vld [vmem:[%s5405_s24 + $0xa0] sm:$0xff] }
  0x12   :  { %117 = vperm.xlu0 %4045, %v83_v13   ;;  %798 = vmatprep.subr.bf16.mxu0 %v4216_v0  ;;  %v248_v33 = vld [vmem:[%s5405_s24 + $0xb8] sm:$0xff]  ;;  %v247_v34 = vld [vmem:[%s5405_s24 + $0xb0] sm:$0xff]  ;;  %v250_v35 = vld [vmem:[%s5405_s24 + $0xc8] sm:$0xff] }
  0x13   :  { %v249_v36 = vld [vmem:[%s5405_s24 + $0xc0] sm:$0xff]  ;;  %v252_v37 = vld [vmem:[%s5405_s24 + $0xd8] sm:$0xff]  ;;  %v251_v38 = vld [vmem:[%s5405_s24 + $0xd0] sm:$0xff] }
  0x14   :  { %3682 = vmatmul.mubr.msk.bf16.vlgmr.msra.gmra.mrb[0].mxu0 %vm148_vm0, %v4048_v14  ;;  %v254_v39 = vld [vmem:[%s5405_s24 + $0xe8] sm:$0xff]  ;;  %v253_v40 = vld [vmem:[%s5405_s24 + $0xe0] sm:$0xff]  ;;  %v256_v41 = vld [vmem:[%s5405_s24 + $0xf8] sm:$0xff] }
  0x15   :  { %290 = vperm.xlu1 %4046, %v232_v16   ;;  %3685 = vmatprep.mubr.msk.bf16.mxu0 %vm148_vm0, %v4049_v15  ;;  %v255_v42 = vld [vmem:[%s5405_s24 + $0xf0] sm:$0xff]  ;;  %v690_v43 = vld [vmem:[%s5405_s24 + $0x108] sm:$0xff]  ;;  %v257_v44 = vld [vmem:[%s5405_s24 + $0x100] sm:$0xff] }
  0x16   :  { %127 = vperm.xlu0 %4045, %v85_v17   ;;  %v692_v45 = vld [vmem:[%s5405_s24 + $0x118] sm:$0xff]  ;;  %v691_v46 = vld [vmem:[%s5405_s24 + $0x110] sm:$0xff]  ;;  %v694_v47 = vld [vmem:[%s5405_s24 + $0x128] sm:$0xff] }
  0x17   :  { %v693_v48 = vld [vmem:[%s5405_s24 + $0x120] sm:$0xff]  ;;  %v696_v49 = vld [vmem:[%s5405_s24 + $0x138] sm:$0xf]  ;;  %v695_v50 = vld [vmem:[%s5405_s24 + $0x130] sm:$0xff] }
  0x18   :  { %v990_v51 = vld [vmem:[%s5405_s24 + $0x148] sm:$0xff]  ;;  %v989_v52 = vld [vmem:[%s5405_s24 + $0x140] sm:$0xff]  ;;  %v992_v53 = vld [vmem:[%s5405_s24 + $0x158] sm:$0xff] }
  0x19   :  { %300 = vperm.xlu1 %4046, %v234_v18   ;;  %v991_v54 = vld [vmem:[%s5405_s24 + $0x150] sm:$0xff]  ;;  %v994_v55 = vld [vmem:[%s5405_s24 + $0x168] sm:$0xff]  ;;  %v993_v56 = vld [vmem:[%s5405_s24 + $0x160] sm:$0xff] }
  0x1a   :  { %295 = vperm.xlu0 %4045, %v233_v19   ;;  %v1202_v57 = vld [vmem:[%s5405_s24 + $0x178] sm:$0xff]  ;;  %v995_v58 = vld [vmem:[%s5405_s24 + $0x170] sm:$0xf]  ;;  %v1204_v59 = vld [vmem:[%s5405_s24 + $0x188] sm:$0xff] }
  0x1b   :  { %v1203_v60 = vld [vmem:[%s5405_s24 + $0x180] sm:$0xff]  ;;  %v1206_v61 = vld [vmem:[%s5405_s24 + $0x198] sm:$0xff]  ;;  %v1205_v62 = vld [vmem:[%s5405_s24 + $0x190] sm:$0xff] }
  0x1c   :  { %3686 = vmatmul.mubr.msk.bf16.gmra.mrb[4].mxu0 %vm148_vm0, %v4050_v20  ;;  %v1208_v63 = vld [vmem:[%s5405_s24 + $0x1a8] sm:$0xff]  ;;  %v1207_v1 = vld [vmem:[%s5405_s24 + $0x1a0] sm:$0xff]  ;;  %v1370_v3 = vld [vmem:[%s5405_s24 + $0x1b8] sm:$0xff] }
  0x1d   :  { %310 = vperm.xlu1 %4046, %v236_v21   ;;  %v1209_v4 = vld [vmem:[%s5405_s24 + $0x1b0] sm:$0xff]  ;;  %v1372_v5 = vld [vmem:[%s5405_s24 + $0x1c8] sm:$0xff]  ;;  %v1371_v6 = vld [vmem:[%s5405_s24 + $0x1c0] sm:$0xff] }
  0x1e   :  { %305 = vperm.xlu0 %4045, %v235_v22   ;;  %v1471_v7 = vld [vmem:[%s5405_s24 + $0x1d8] sm:$0xff]  ;;  %v1373_v8 = vld [vmem:[%s5405_s24 + $0x1d0] sm:$0xff]  ;;  %v1473_v9 = vld [vmem:[%s5405_s24 + $0x1e8] sm:$0xff] }
  0x1f   :  { %v1472_v10 = vld [vmem:[%s5405_s24 + $0x1e0] sm:$0xff]  ;;  %v1475_v11 = vld [vmem:[%s5405_s24 + $0x1f8] sm:$0xff]  ;;  %v1474_v12 = vld [vmem:[%s5405_s24 + $0x1f0] sm:$0xff] }
  0x20   :  { %v1477_v13 = vld [vmem:[%s5405_s24 + $0x208] sm:$0xff]  ;;  %v1476_v14 = vld [vmem:[%s5405_s24 + $0x200] sm:$0xff]  ;;  %v1723_v15 = vld [vmem:[%s5405_s24 + $0x218] sm:$0xff] }
  0x21   :  { %320 = vperm.xlu1 %4046, %v238_v23   ;;  %v1478_v16 = vld [vmem:[%s5405_s24 + $0x210] sm:$0xff]  ;;  %v1725_v17 = vld [vmem:[%s5405_s24 + $0x228] sm:$0xff]  ;;  %v1724_v18 = vld [vmem:[%s5405_s24 + $0x220] sm:$0xff] }
  0x22   :  { %315 = vperm.xlu0 %4045, %v237_v24   ;;  %v1727_v19 = vld [vmem:[%s5405_s24 + $0x238] sm:$0xff]  ;;  %v1726_v20 = vld [vmem:[%s5405_s24 + $0x230] sm:$0xff]  ;;  %v1729_v21 = vld [vmem:[%s5405_s24 + $0x248] sm:$0xff] }
  0x23   :  { %v1728_v22 = vld [vmem:[%s5405_s24 + $0x240] sm:$0xff]  ;;  %v1952_v23 = vld [vmem:[%s5405_s24 + $0x258] sm:$0xff]  ;;  %v1730_v24 = vld [vmem:[%s5405_s24 + $0x250] sm:$0xff] }
  0x25   :  { %330 = vperm.xlu1 %4046, %v240_v25   ;;  %v2098_v25 = vld [vmem:[%s5405_s24 + $0x268] sm:$0xff] }
  0x26   :  { %325 = vperm.xlu0 %4045, %v239_v26   ;;  %v1953_v26 = vld [vmem:[%s5405_s24 + $0x260] sm:$0xff] }
  0x29   :  { %340 = vperm.xlu1 %4046, %v242_v27   ;;  %v2100_v27 = vld [vmem:[%s5405_s24 + $0x278] sm:$0xff] }
  0x2a   :  { %335 = vperm.xlu0 %4045, %v241_v28   ;;  %v2099_v28 = vld [vmem:[%s5405_s24 + $0x270] sm:$0xff] }
  0x2d   :  { %350 = vperm.xlu1 %4046, %v244_v29   ;;  %v2354_v29 = vld [vmem:[%s5405_s24 + $0x290] sm:$0x7] }
  0x2e   :  { %345 = vperm.xlu0 %4045, %v243_v30   ;;  %v2101_v30 = vld [vmem:[%s5405_s24 + $0x280] sm:$0xff] }
  0x31   :  { %360 = vperm.xlu1 %4046, %v246_v31   ;;  %v2411_v31 = vld [vmem:[%s5405_s24 + $0x298] sm:$0xff] }
  0x32   :  { %355 = vperm.xlu0 %4045, %v245_v32   ;;  %v2197_v32 = vld [vmem:[%s5405_s24 + $0x288] sm:$0xff] }
  0x35   :  { %370 = vperm.xlu1 %4046, %v248_v33   ;;  %v3292_v33 = vld [vmem:[%s5405_s24 + $0x2a0] sm:$0xff]  ;;  %s5409_s24 = sld [smem:[#allocation6_spill]] }
  0x36   :  { %365 = vperm.xlu0 %4045, %v247_v34  }
  0x39   :  { %380 = vperm.xlu1 %4046, %v250_v35  }
  0x3a   :  { %375 = vperm.xlu0 %4045, %v249_v36  }
  0x3d   :  { %390 = vperm.xlu1 %4046, %v252_v37  }
  0x3e   :  { %385 = vperm.xlu0 %4045, %v251_v38  }
  0x41   :  { %400 = vperm.xlu1 %4046, %v254_v39  }
  0x42   :  { %395 = vperm.xlu0 %4045, %v253_v40  }
  0x45   :  { %410 = vperm.xlu1 %4046, %v256_v41  }
  0x46   :  { %405 = vperm.xlu0 %4045, %v255_v42  }
  0x49   :  { %719 = vperm.xlu1 %4046, %v690_v43  }
  0x4a   :  { %415 = vperm.xlu0 %4045, %v257_v44  }
  0x4d   :  { %729 = vperm.xlu1 %4046, %v692_v45  }
  0x4e   :  { %724 = vperm.xlu0 %4045, %v691_v46  }
  0x51   :  { %739 = vperm.xlu1 %4046, %v694_v47  }
  0x52   :  { %734 = vperm.xlu0 %4045, %v693_v48  }
  0x55   :  { %749 = vperm.xlu1 %4046, %v696_v49  }
  0x56   :  { %744 = vperm.xlu0 %4045, %v695_v50  }
  0x59   :  { %1014 = vperm.xlu1 %4046, %v990_v51  }
  0x5a   :  { %1009 = vperm.xlu0 %4045, %v989_v52  }
  0x5d   :  { %1024 = vperm.xlu1 %4046, %v992_v53  }
  0x5e   :  { %1019 = vperm.xlu0 %4045, %v991_v54  }
  0x61   :  { %1034 = vperm.xlu1 %4046, %v994_v55  }
  0x62   :  { %1029 = vperm.xlu0 %4045, %v993_v56  }
  0x65   :  { %1224 = vperm.xlu1 %4046, %v1202_v57  }
  0x66   :  { %1039 = vperm.xlu0 %4045, %v995_v58  }
  0x69   :  { %1234 = vperm.xlu1 %4046, %v1204_v59  }
  0x6a   :  { %1229 = vperm.xlu0 %4045, %v1203_v60  }
  0x6d   :  { %1244 = vperm.xlu1 %4046, %v1206_v61  }
  0x6e   :  { %1239 = vperm.xlu0 %4045, %v1205_v62  }
  0x71   :  { %1254 = vperm.xlu1 %4046, %v1208_v63  }
  0x72   :  { %1249 = vperm.xlu0 %4045, %v1207_v1  }
  0x75   :  { %1384 = vperm.xlu1 %4046, %v1370_v3  }
  0x76   :  { %1259 = vperm.xlu0 %4045, %v1209_v4  }
  0x79   :  { %1394 = vperm.xlu1 %4046, %v1372_v5  }
  0x7a   :  { %1389 = vperm.xlu0 %4045, %v1371_v6   ;;  %v4051_v6 = vld [vmem:[%s5408_s2] sm:$0xff]  }
  0x7d   :  { %1491 = vperm.xlu1 %4046, %v1471_v7   ;;  %v4052_v7 = vld [vmem:[%s5408_s2 + $0x8] sm:$0xff]  }
  0x7e   :  { %1399 = vperm.xlu0 %4045, %v1373_v8   ;;  %v4053_v8 = vld [vmem:[%s5408_s2 + $0x10] sm:$0xff]  }
  0x81   :  { %1501 = vperm.xlu1 %4046, %v1473_v9   ;;  %v4054_v9 = vld [vmem:[%s5408_s2 + $0x18] sm:$0xff]  }
  0x82   :  { %1496 = vperm.xlu0 %4045, %v1472_v10   ;;  %v4055_v10 = vld [vmem:[%s5408_s2 + $0x20] sm:$0xff]  }
  0x85   :  { %1511 = vperm.xlu1 %4046, %v1475_v11   ;;  %v4056_v11 = vld [vmem:[%s5408_s2 + $0x28] sm:$0xff]  }
  0x86   :  { %1506 = vperm.xlu0 %4045, %v1474_v12   ;;  %v4057_v12 = vld [vmem:[%s5408_s2 + $0x30] sm:$0xff]  }
  0x88   :  { %v98_v34 = vpop.permute.xlu0 %97  ;;  %v108_v36 = vpop.permute.xlu1 %107 }
  0x89   :  { %1521 = vperm.xlu1 %4046, %v1477_v13   ;;  %v4058_v13 = vld [vmem:[%s5408_s2 + $0x38] sm:$0xff]  }
  0x8a   :  { %1516 = vperm.xlu0 %4045, %v1476_v14   ;;  %v4059_v14 = vld [vmem:[%s5408_s2 + $0x40] sm:$0xff]  }
  0x8c   :  { %v113_v42 = vpop.permute.xlu1 %112 }
  0x8d   :  { %1745 = vperm.xlu1 %4046, %v1723_v15   ;;  %v103_v35 = vpop.permute.xlu0 %102  ;;  %v4060_v15 = vld [vmem:[%s5408_s2 + $0x48] sm:$0xff]  }
  0x8e   :  { %1526 = vperm.xlu0 %4045, %v1478_v16   ;;  %v4061_v16 = vld [vmem:[%s5408_s2 + $0x50] sm:$0xff]  }
  0x90   :  { %v123_v58 = vpop.permute.xlu1 %122 }
  0x91   :  { %1755 = vperm.xlu1 %4046, %v1725_v17   ;;  %v118_v39 = vpop.permute.xlu0 %117  ;;  %v4062_v17 = vld [vmem:[%s5408_s2 + $0x58] sm:$0xff]  }
  0x92   :  { %1750 = vperm.xlu0 %4045, %v1724_v18   ;;  %v4063_v18 = vld [vmem:[%s5408_s2 + $0x60] sm:$0xff]  }
  0x95   :  { %1765 = vperm.xlu1 %4046, %v1727_v19   ;;  %v128_v49 = vpop.permute.xlu0 %127  ;;  %v4066_v19 = vld [vmem:[%s5409_s24 + $0x4] ss:$8 sps:$4 sm:$0xff]  }
  0x96   :  { %1760 = vperm.xlu0 %4045, %v1726_v20   ;;  %3396 = vmatprep.mubr.msk.bf16.mxu0 %vm785_vm4, %v4066_v19  ;;  %v291_v20 = vpop.permute.xlu1 %290 }
  0x99   :  { %1775 = vperm.xlu1 %4046, %v1729_v21  }
  0x9a   :  { %1770 = vperm.xlu0 %4045, %v1728_v22  }
  0x9d   :  { %1962 = vperm.xlu1 %4046, %v1952_v23  }
  0x9e   :  { %1780 = vperm.xlu0 %4045, %v1730_v24   ;;  %v296_v24 = vpop.permute.xlu0 %295 }
  0xa1   :  { %2109 = vperm.xlu1 %4046, %v2098_v25  }
  0xa2   :  { %1967 = vperm.xlu0 %4045, %v1953_v26  }
  0xa5   :  { %2119 = vperm.xlu1 %4046, %v2100_v27  }
  0xa6   :  { %2114 = vperm.xlu0 %4045, %v2099_v28  }
  0xa9   :  { %2359 = vperm.xlu1 %4046, %v2354_v29  }
  0xaa   :  { %2124 = vperm.xlu0 %4045, %v2101_v30   ;;  %v4750_v30 = vld [vmem:[%s5410_s6] sm:$0xff]  }
  0xad   :  { %2416 = vperm.xlu1 %4046, %v2411_v31  }
  0xae   :  { %2203 = vperm.xlu0 %4045, %v2197_v32   ;;  %v301_v32 = vpop.permute.xlu1 %300 }
  0xb2   :  { %3301 = vperm.xlu0 %4045, %v3292_v33  }
  0xe7   :  { %v3683_v37 = vpop.f32.mrb[0].mxu0 }
  0xe8   :  { %v195_v38 = vpop.f32.mrb[1].mxu0  ;;  %v4635_v46 = vadd.f32 %v3683_v37, %v108_v36  ;;  %v306_v36 = vpop.permute.xlu0 %305 }
  0xe9   :  { %v4629_v40 = vadd.f32 %v195_v38, %v98_v34  ;;  %v3684_v41 = vpop.f32.mrb[2].mxu0 }
  0xea   :  { %v198_v43 = vpop.f32.mrb[3].mxu0  ;;  %v4631_v44 = vadd.f32 %v3684_v41, %v113_v42  ;;  %v227_v55 = vmax.f32 %v4635_v46, 0.0 }
  0xeb   :  { %v4633_v45 = vadd.f32 %v198_v43, %v103_v35  ;;  %v225_v47 = vmax.f32 %v4629_v40, 0.0 }
  0xec   :  { %v228_v50 = vmax.f32 %v4631_v44, 0.0 }
  0xed   :  { %v226_v48 = vmax.f32 %v4633_v45, 0.0 }
  0xee   :  { %v285_v60 = vpack.c.bf16 %v228_v50, %v227_v55 }
  0xef   :  { %v3687_v51 = vpop.f32.mrb[4].mxu0  ;;  %v284_v52 = vpack.c.bf16 %v226_v48, %v225_v47 }
  0xf0   :  { %v220_v53 = vadd.f32 %v3687_v51, %v128_v49  ;;  %v211_v54 = vpop.f32.mrb[5].mxu0  ;;  %v311_v49 = vpop.permute.xlu1 %310 }
  0xf1   :  { %v4645_v56 = vadd.f32 %v211_v54, %v118_v39  ;;  %v3688_v57 = vpop.f32.mrb[6].mxu0  ;;  %3690 = vmatpush3.bf16.msra.mxu1 %v284_v52  ;;  %v316_v54 = vpop.permute.xlu0 %315 }
  0xf2   :  { %v214_v59 = vpop.f32.mrb[7].mxu0  ;;  %3691 = vmatprep.subr.bf16.mxu1 %v4217_v2  ;;  %v4654_v62 = vmax.f32 %v220_v53, 0.0 }
  0xf3   :  { %v4652_v61 = vadd.f32 %v214_v59, %v123_v58  ;;  %v229_v63 = vmax.f32 %v4645_v56, 0.0 }
  0xf4   :  { %v287_v4 = vpack.c.bf16 %v4654_v62, %v4654_v62 }
  0xf5   :  { %v230_v1 = vmax.f32 %v4652_v61, 0.0  ;;  %3692 = vmatpush3.bf16.msra.mxu1 %v285_v60 }
  0xf6   :  { %3693 = vmatprep.subr.bf16.mxu1 %v4217_v2  ;;  %v525_v5 = vsel %vm523_vm2, %v287_v4, 0 }
  0xf7   :  { %v286_v3 = vpack.c.bf16 %v230_v1, %v229_v63 }
  0xf9   :  { %3694 = vmatpush3.bf16.msra.mxu1 %v286_v3 }
  0xfa   :  { %3695 = vmatprep.subr.bf16.mxu1 %v4217_v2 }
  0xfd   :  { %3696 = vmatpush3.bf16.msra.mxu1 %v525_v5  ;;  %v321_v5 = vpop.permute.xlu1 %320 }
  0xfe   :  { %3821 = vmatprep.subr.bf16.mxu1 %v4750_v30 }
 0x100   :  { %3698 = vmatmul.mubr.msk.bf16.vlgmr.msra.gmra.mrb[0].mxu1 %vm483_vm3, %v4051_v6 }
 0x101   :  { %3701 = vmatprep.mubr.msk.bf16.mxu1 %vm4218_vm1, %v4217_v2  ;;  %3822 = vmatpush3.bf16.msra.mxu1 %v4750_v30 }
 0x108   :  { %3702 = vmatmul.mubr.msk.bf16.gmra.mrb[4].mxu1 %vm483_vm3, %v4052_v7 }
 0x109   :  { %3705 = vmatprep.mubr.msk.bf16.mxu1 %vm4218_vm1, %v4217_v2 }
 0x110   :  { %3706 = vmatmul.mubr.msk.bf16.gmra.mrb[8].mxu1 %vm483_vm3, %v4053_v8 }
 0x111   :  { %3709 = vmatprep.mubr.msk.bf16.mxu1 %vm4218_vm1, %v4217_v2 }
 0x118   :  { %3710 = vmatmul.mubr.msk.bf16.gmra.mrb[12].mxu1 %vm483_vm3, %v4054_v9  ;;  %v326_v9 = vpop.permute.xlu0 %325 }
 0x119   :  { %3713 = vmatprep.mubr.msk.bf16.mxu1 %vm4218_vm1, %v4217_v2 }
 0x120   :  { %3714 = vmatmul.mubr.msk.bf16.gmra.mrb[16].mxu1 %vm483_vm3, %v4055_v10 }
 0x121   :  { %3717 = vmatprep.mubr.msk.bf16.mxu1 %vm4218_vm1, %v4217_v2 }
 0x128   :  { %3718 = vmatmul.mubr.msk.bf16.gmra.mrb[20].mxu1 %vm483_vm3, %v4056_v11 }
 0x129   :  { %3721 = vmatprep.mubr.msk.bf16.mxu1 %vm4218_vm1, %v4217_v2 }
 0x130   :  { %3722 = vmatmul.mubr.msk.bf16.gmra.mrb[24].mxu1 %vm483_vm3, %v4057_v12 }
 0x131   :  { %3725 = vmatprep.mubr.msk.bf16.mxu1 %vm4218_vm1, %v4217_v2 }
 0x138   :  { %3726 = vmatmul.mubr.msk.bf16.gmra.mrb[28].mxu1 %vm483_vm3, %v4058_v13 }
 0x139   :  { %3729 = vmatprep.mubr.msk.bf16.mxu1 %vm4218_vm1, %v4217_v2 }
 0x140   :  { %3730 = vmatmul.mubr.msk.bf16.gmra.mrb[32].mxu1 %vm483_vm3, %v4059_v14 }
 0x141   :  { %3733 = vmatprep.mubr.msk.bf16.mxu1 %vm4218_vm1, %v4217_v2 }
 0x148   :  { %3734 = vmatmul.mubr.msk.bf16.gmra.mrb[36].mxu1 %vm483_vm3, %v4060_v15 }
 0x149   :  { %3737 = vmatprep.mubr.msk.bf16.mxu1 %vm4218_vm1, %v4217_v2 }
 0x150   :  { %3738 = vmatmul.mubr.msk.bf16.gmra.mrb[40].mxu1 %vm483_vm3, %v4061_v16  ;;  %v331_v16 = vpop.permute.xlu1 %330 }
 0x151   :  { %3741 = vmatprep.mubr.msk.bf16.mxu1 %vm4218_vm1, %v4217_v2 }
 0x158   :  { %3742 = vmatmul.mubr.msk.bf16.gmra.mrb[44].mxu1 %vm483_vm3, %v4062_v17 }
 0x159   :  { %3745 = vmatprep.mubr.msk.bf16.mxu1 %vm4218_vm1, %v4217_v2 }
 0x160   :  { %3746 = vmatmul.mubr.msk.bf16.gmra.mrb[48].mxu1 %vm483_vm3, %v4063_v18 }
 0x1d3   :  { %v561_v21 = vpop.f32.mrb[0].mxu1 }
 0x1d4   :  { %v562_v22 = vadd.f32 %v561_v21, %v291_v20  ;;  %v3699_v23 = vpop.f32.mrb[1].mxu1  ;;  %v336_v20 = vpop.permute.xlu0 %335 }
 0x1d5   :  { %v564_v25 = vpop.f32.mrb[2].mxu1 }
 0x1d6   :  { %v565_v26 = vadd.f32 %v564_v25, %v296_v24  ;;  %v3700_v27 = vpop.f32.mrb[3].mxu1  ;;  %v664_v28 = vmax.f32 %v562_v22, 0.0 }
 0x1d7   :  { %v341_v27 = vpop.permute.xlu1 %340 }
 0x1d8   :  { %v665_v29 = vmax.f32 %v565_v26, 0.0 }
 0x1da   :  { %v704_v31 = vpack.c.bf16 %v665_v29, %v664_v28 }
 0x1db   :  { %v569_v33 = vpop.f32.mrb[4].mxu1 }
 0x1dc   :  { %v570_v34 = vadd.f32 %v569_v33, %v301_v32  ;;  %v3703_v35 = vpop.f32.mrb[5].mxu1  ;;  %799 = vmatpush1.bf16.msra.mxu0 %v704_v31  ;;  %v346_v32 = vpop.permute.xlu0 %345 }
 0x1dd   :  { %v572_v37 = vpop.f32.mrb[6].mxu1  ;;  %800 = vmatprep.subr.bf16.mxu0 %v4216_v0 }
 0x1de   :  { %v573_v38 = vadd.f32 %v572_v37, %v306_v36  ;;  %v3704_v39 = vpop.f32.mrb[7].mxu1  ;;  %v666_v41 = vmax.f32 %v570_v34, 0.0 }
 0x1df   :  { %v351_v39 = vpop.permute.xlu1 %350 }
 0x1e0   :  { %v667_v42 = vmax.f32 %v573_v38, 0.0 }
 0x1e2   :  { %v705_v43 = vpack.c.bf16 %v667_v42, %v666_v41 }
 0x1e3   :  { %v577_v51 = vpop.f32.mrb[8].mxu1 }
 0x1e4   :  { %v578_v52 = vadd.f32 %v577_v51, %v311_v49  ;;  %v3707_v53 = vpop.f32.mrb[9].mxu1  ;;  %801 = vmatpush1.bf16.msra.mxu0 %v705_v43  ;;  %v356_v49 = vpop.permute.xlu0 %355 }
 0x1e5   :  { %v580_v57 = vpop.f32.mrb[10].mxu1  ;;  %802 = vmatprep.subr.bf16.mxu0 %v4216_v0 }
 0x1e6   :  { %v581_v58 = vadd.f32 %v580_v57, %v316_v54  ;;  %v3708_v59 = vpop.f32.mrb[11].mxu1  ;;  %v668_v60 = vmax.f32 %v578_v52, 0.0 }
 0x1e7   :  { %v361_v59 = vpop.permute.xlu1 %360 }
 0x1e8   :  { %v669_v3 = vmax.f32 %v581_v58, 0.0 }
 0x1ea   :  { %v706_v4 = vpack.c.bf16 %v669_v3, %v668_v60 }
 0x1eb   :  { %v585_v6 = vpop.f32.mrb[12].mxu1 }
 0x1ec   :  { %v586_v7 = vadd.f32 %v585_v6, %v321_v5  ;;  %v3711_v8 = vpop.f32.mrb[13].mxu1  ;;  %803 = vmatpush1.bf16.msra.mxu0 %v706_v4  ;;  %v366_v5 = vpop.permute.xlu0 %365 }
 0x1ed   :  { %v588_v10 = vpop.f32.mrb[14].mxu1  ;;  %804 = vmatprep.subr.bf16.mxu0 %v4216_v0 }
 0x1ee   :  { %v589_v11 = vadd.f32 %v588_v10, %v326_v9  ;;  %v3712_v12 = vpop.f32.mrb[15].mxu1  ;;  %v670_v13 = vmax.f32 %v586_v7, 0.0 }
 0x1ef   :  { %v371_v12 = vpop.permute.xlu1 %370 }
 0x1f0   :  { %v671_v14 = vmax.f32 %v589_v11, 0.0 }
 0x1f2   :  { %v707_v15 = vpack.c.bf16 %v671_v14, %v670_v13 }
 0x1f3   :  { %v593_v17 = vpop.f32.mrb[16].mxu1 }
 0x1f4   :  { %v594_v18 = vadd.f32 %v593_v17, %v331_v16  ;;  %v3715_v19 = vpop.f32.mrb[17].mxu1  ;;  %805 = vmatpush1.bf16.msra.mxu0 %v707_v15  ;;  %v376_v16 = vpop.permute.xlu0 %375 }
 0x1f5   :  { %v596_v21 = vpop.f32.mrb[18].mxu1  ;;  %806 = vmatprep.subr.bf16.mxu0 %v4216_v0 }
 0x1f6   :  { %v597_v22 = vadd.f32 %v596_v21, %v336_v20  ;;  %v3716_v23 = vpop.f32.mrb[19].mxu1  ;;  %v672_v24 = vmax.f32 %v594_v18, 0.0 }
 0x1f7   :  { %v381_v23 = vpop.permute.xlu1 %380 }
 0x1f8   :  { %v673_v25 = vmax.f32 %v597_v22, 0.0 }
 0x1fa   :  { %v708_v26 = vpack.c.bf16 %v673_v25, %v672_v24 }
 0x1fb   :  { %v601_v28 = vpop.f32.mrb[20].mxu1 }
 0x1fc   :  { %v602_v29 = vadd.f32 %v601_v28, %v341_v27  ;;  %v3719_v31 = vpop.f32.mrb[21].mxu1  ;;  %807 = vmatpush1.bf16.msra.mxu0 %v708_v26  ;;  %v386_v27 = vpop.permute.xlu0 %385 }
 0x1fd   :  { %v604_v33 = vpop.f32.mrb[22].mxu1  ;;  %808 = vmatprep.subr.bf16.mxu0 %v4216_v0 }
 0x1fe   :  { %v605_v34 = vadd.f32 %v604_v33, %v346_v32  ;;  %v3720_v35 = vpop.f32.mrb[23].mxu1  ;;  %v674_v36 = vmax.f32 %v602_v29, 0.0 }
 0x1ff   :  { %v391_v35 = vpop.permute.xlu1 %390 }
 0x200   :  { %v675_v37 = vmax.f32 %v605_v34, 0.0 }
 0x202   :  { %v709_v38 = vpack.c.bf16 %v675_v37, %v674_v36 }
 0x203   :  { %v609_v41 = vpop.f32.mrb[24].mxu1 }
 0x204   :  { %v610_v42 = vadd.f32 %v609_v41, %v351_v39  ;;  %v3723_v43 = vpop.f32.mrb[25].mxu1  ;;  %809 = vmatpush1.bf16.msra.mxu0 %v709_v38  ;;  %v396_v39 = vpop.permute.xlu0 %395 }
 0x205   :  { %v612_v51 = vpop.f32.mrb[26].mxu1  ;;  %810 = vmatprep.subr.bf16.mxu0 %v4216_v0 }
 0x206   :  { %v613_v52 = vadd.f32 %v612_v51, %v356_v49  ;;  %v3724_v53 = vpop.f32.mrb[27].mxu1  ;;  %v676_v54 = vmax.f32 %v610_v42, 0.0 }
 0x207   :  { %v401_v53 = vpop.permute.xlu1 %400 }
 0x208   :  { %v677_v57 = vmax.f32 %v613_v52, 0.0 }
 0x20a   :  { %v710_v58 = vpack.c.bf16 %v677_v57, %v676_v54 }
 0x20b   :  { %v617_v60 = vpop.f32.mrb[28].mxu1 }
 0x20c   :  { %v618_v3 = vadd.f32 %v617_v60, %v361_v59  ;;  %v3727_v4 = vpop.f32.mrb[29].mxu1  ;;  %811 = vmatpush1.bf16.msra.mxu0 %v710_v58  ;;  %v406_v59 = vpop.permute.xlu0 %405 }
 0x20d   :  { %v620_v6 = vpop.f32.mrb[30].mxu1  ;;  %812 = vmatprep.subr.bf16.mxu0 %v4216_v0 }
 0x20e   :  { %v621_v7 = vadd.f32 %v620_v6, %v366_v5  ;;  %v3728_v8 = vpop.f32.mrb[31].mxu1  ;;  %v678_v9 = vmax.f32 %v618_v3, 0.0 }
 0x20f   :  { %v411_v8 = vpop.permute.xlu1 %410 }
 0x210   :  { %v679_v10 = vmax.f32 %v621_v7, 0.0 }
 0x212   :  { %v711_v11 = vpack.c.bf16 %v679_v10, %v678_v9 }
 0x213   :  { %v625_v13 = vpop.f32.mrb[32].mxu1 }
 0x214   :  { %v626_v14 = vadd.f32 %v625_v13, %v371_v12  ;;  %v3731_v15 = vpop.f32.mrb[33].mxu1  ;;  %813 = vmatpush1.bf16.msra.mxu0 %v711_v11  ;;  %v416_v12 = vpop.permute.xlu0 %415 }
 0x215   :  { %v628_v17 = vpop.f32.mrb[34].mxu1  ;;  %814 = vmatprep.subr.bf16.mxu0 %v4216_v0 }
 0x216   :  { %v629_v18 = vadd.f32 %v628_v17, %v376_v16  ;;  %v3732_v19 = vpop.f32.mrb[35].mxu1  ;;  %v680_v20 = vmax.f32 %v626_v14, 0.0 }
 0x217   :  { %v4064_v19 = vld [vmem:[%s5409_s24] ss:$8 sps:$4 sm:$0xff]  }
 0x218   :  { %v681_v21 = vmax.f32 %v629_v18, 0.0 }
 0x21a   :  { %v712_v22 = vpack.c.bf16 %v681_v21, %v680_v20  ;;  %v4067_v20 = vld [vmem:[%s5409_s24 + $0x14] ss:$8 sps:$4 sm:$0xff]   ;;  %v4069_v21 = vld [vmem:[%s5409_s24 + $0x10] ss:$8 sps:$4 sm:$0xff]  }
 0x21b   :  { %v633_v24 = vpop.f32.mrb[36].mxu1 }
 0x21c   :  { %v634_v25 = vadd.f32 %v633_v24, %v381_v23  ;;  %v3735_v26 = vpop.f32.mrb[37].mxu1  ;;  %815 = vmatpush1.bf16.msra.mxu0 %v712_v22  ;;  %v4070_v22 = vld [vmem:[%s5409_s24 + $0x24] ss:$8 sps:$4 sm:$0xff]   ;;  %v703_v23 = vld [vmem:[%s5409_s24 + $0x30] sm:$0x33] }
 0x21d   :  { %v636_v28 = vpop.f32.mrb[38].mxu1  ;;  %816 = vmatprep.subr.bf16.mxu0 %v4216_v0  ;;  %v4072_v24 = vld [vmem:[%s5409_s24 + $0x20] ss:$8 sps:$4 sm:$0xff]  }
 0x21e   :  { %v637_v29 = vadd.f32 %v636_v28, %v386_v27  ;;  %v3736_v31 = vpop.f32.mrb[39].mxu1  ;;  %v682_v32 = vmax.f32 %v634_v25, 0.0  ;;  %v3394_v25 = vcombine.low %v703_v23, %v703_v23  ;;  %v4076_v26 = vld [vmem:[%s5410_s6 + $0x8] sm:$0xff]   ;;  %v4077_v27 = vld [vmem:[%s5410_s6 + $0x10] sm:$0xff]   ;;  %v4078_v28 = vld [vmem:[%s5410_s6 + $0x18] sm:$0xff]  }
 0x21f   :  { %3823 = vmatprep.subr.bf16.mxu1 %v4076_v26 }
 0x220   :  { %v683_v33 = vmax.f32 %v637_v29, 0.0  ;;  %3824 = vmatpush3.bf16.msra.mxu1 %v4076_v26  ;;  %v720_v29 = vpop.permute.xlu1 %719 }
 0x221   :  { %3825 = vmatprep.subr.bf16.mxu1 %v4077_v27 }
 0x222   :  { %v713_v34 = vpack.c.bf16 %v683_v33, %v682_v32 }
 0x223   :  { %v641_v36 = vpop.f32.mrb[40].mxu1 }
 0x224   :  { %v642_v37 = vadd.f32 %v641_v36, %v391_v35  ;;  %v3739_v38 = vpop.f32.mrb[41].mxu1  ;;  %817 = vmatpush1.bf16.msra.mxu0 %v713_v34  ;;  %3826 = vmatpush3.bf16.msra.mxu1 %v4077_v27  ;;  %v725_v34 = vpop.permute.xlu0 %724 }
 0x225   :  { %v644_v41 = vpop.f32.mrb[42].mxu1  ;;  %818 = vmatprep.subr.bf16.mxu0 %v4216_v0  ;;  %3827 = vmatprep.subr.bf16.mxu1 %v4078_v28 }
 0x226   :  { %v645_v42 = vadd.f32 %v644_v41, %v396_v39  ;;  %v3740_v43 = vpop.f32.mrb[43].mxu1  ;;  %v684_v49 = vmax.f32 %v642_v37, 0.0 }
 0x227   :  { %v730_v43 = vpop.permute.xlu1 %729 }
 0x228   :  { %v685_v51 = vmax.f32 %v645_v42, 0.0  ;;  %3828 = vmatpush3.bf16.msra.mxu1 %v4078_v28 }
 0x229   :  { %3853 = vmatprep.subr.bf16.mxu1 %v4217_v2 }
 0x22a   :  { %v714_v52 = vpack.c.bf16 %v685_v51, %v684_v49 }
 0x22b   :  { %v649_v54 = vpop.f32.mrb[44].mxu1 }
 0x22c   :  { %v650_v57 = vadd.f32 %v649_v54, %v401_v53  ;;  %v3743_v58 = vpop.f32.mrb[45].mxu1  ;;  %819 = vmatpush1.bf16.msra.mxu0 %v714_v52  ;;  %v735_v54 = vpop.permute.xlu0 %734 }
 0x22d   :  { %v652_v60 = vpop.f32.mrb[46].mxu1  ;;  %820 = vmatprep.subr.bf16.mxu0 %v4216_v0 }
 0x22e   :  { %v653_v3 = vadd.f32 %v652_v60, %v406_v59  ;;  %v3744_v4 = vpop.f32.mrb[47].mxu1  ;;  %v686_v5 = vmax.f32 %v650_v57, 0.0 }
 0x230   :  { %v687_v6 = vmax.f32 %v653_v3, 0.0 }
 0x232   :  { %v715_v7 = vpack.c.bf16 %v687_v6, %v686_v5 }
 0x233   :  { %v657_v9 = vpop.f32.mrb[48].mxu1 }
 0x234   :  { %v658_v10 = vadd.f32 %v657_v9, %v411_v8  ;;  %v3747_v11 = vpop.f32.mrb[49].mxu1  ;;  %821 = vmatpush1.bf16.msra.mxu0 %v715_v7  ;;  %v745_v7 = vpop.permute.xlu0 %744 }
 0x235   :  { %v660_v13 = vpop.f32.mrb[50].mxu1  ;;  %822 = vmatprep.subr.bf16.mxu0 %v4216_v0 }
 0x236   :  { %v661_v14 = vadd.f32 %v660_v13, %v416_v12  ;;  %v3748_v15 = vpop.f32.mrb[51].mxu1  ;;  %v688_v16 = vmax.f32 %v658_v10, 0.0 }
 0x238   :  { %v689_v17 = vmax.f32 %v661_v14, 0.0 }
 0x23a   :  { %v716_v18 = vpack.c.bf16 %v689_v17, %v688_v16 }
 0x23c   :  { %823 = vmatpush1.bf16.msra.mxu0 %v716_v18 }
 0x23d   :  { %3749 = vmatprep.subr.bf16.mxu0 %v4750_v30 }
 0x23f   :  { %831 = vmatmul.mubr.bf16.vlgmr.msra.gmra.mrb[8].mxu0 %v4064_v19 }
 0x240   :  { %3397 = vmatprep.mubr.msk.bf16.mxu0 %vm785_vm4, %v4067_v20  ;;  %3750 = vmatpush3.bf16.msra.mxu0 %v4750_v30  ;;  %v3395_v30 = vcombine.high %v703_v23, %v703_v23 }
 0x241   :  { %3751 = vmatprep.subr.bf16.mxu0 %v4076_v26 }
 0x244   :  { %3752 = vmatpush3.bf16.msra.mxu0 %v4076_v26 }
 0x245   :  { %3753 = vmatprep.subr.bf16.mxu0 %v4077_v27 }
 0x247   :  { %839 = vmatmul.mubr.bf16.gmra.mrb[12].mxu0 %v4069_v21 }
 0x248   :  { %3398 = vmatprep.mubr.msk.bf16.mxu0 %vm785_vm4, %v4070_v22  ;;  %3754 = vmatpush3.bf16.msra.mxu0 %v4077_v27 }
 0x249   :  { %3755 = vmatprep.subr.bf16.mxu0 %v4078_v28 }
 0x24c   :  { %3756 = vmatpush3.bf16.msra.mxu0 %v4078_v28 }
 0x24f   :  { %847 = vmatmul.mubr.bf16.gmra.mrb[16].mxu0 %v4072_v24 }
 0x250   :  { %3399 = vmatprep.mubr.msk.bf16.mxu0 %vm785_vm4, %v3395_v30 }
 0x257   :  { %855 = vmatmul.mubr.bf16.gmra.mrb[20].mxu0 %v3394_v25 }
 0x312   :  { %v832_v31 = vpop.f32.mrb[8].mxu0 }
 0x313   :  { %v833_v32 = vadd.f32 %v832_v31, %v720_v29  ;;  %v834_v33 = vpop.f32.mrb[9].mxu0  ;;  %v4080_v29 = vld [vmem:[%s5411_s30 + $0x8] sm:$0xff]   ;;  %v4081_v31 = vld [vmem:[%s5411_s30 + $0x10] sm:$0xff]  }
 0x314   :  { %v835_v35 = vpop.f32.mrb[10].mxu0  ;;  %v4083_v33 = vld [vmem:[%s5412_s29] sm:$0xff]  }
 0x315   :  { %v862_v36 = vmax.f32 %v833_v32, 0.0  ;;  %v836_v37 = vadd.f32 %v835_v35, %v725_v34  ;;  %v837_v38 = vpop.f32.mrb[11].mxu0  ;;  %v4082_v32 = vld [vmem:[%s5411_s30 + $0x18] ss:$0 sps:$4 sm:$0x33]   ;;  %v1010_v34 = vpop.permute.xlu0 %1009 }
 0x317   :  { %v863_v39 = vmax.f32 %v836_v37, 0.0  ;;  %v4801_v41 = vadd.f32 %v862_v36, %v225_v47 }
 0x319   :  { %v4805_v42 = vadd.f32 %v863_v39, %v226_v48  ;;  %v740_v48 = vpop.permute.xlu1 %739  ;;  %v1020_v36 = vpop.permute.xlu0 %1019 }
 0x31a   :  { %v840_v49 = vpop.f32.mrb[12].mxu0 }
 0x31b   :  { %v841_v51 = vadd.f32 %v840_v49, %v730_v43  ;;  %v842_v52 = vpop.f32.mrb[13].mxu0  ;;  %v876_v53 = vpack.c.bf16 %v4805_v42, %v4801_v41 }
 0x31c   :  { %v843_v57 = vpop.f32.mrb[14].mxu0 }
 0x31d   :  { %v864_v58 = vmax.f32 %v841_v51, 0.0  ;;  %v844_v59 = vadd.f32 %v843_v57, %v735_v54  ;;  %v845_v60 = vpop.f32.mrb[15].mxu0  ;;  %3757 = vmatprep.mubr.msk.bf16.mxu0 %vm912_vm5, %v876_v53  ;;  %v1030_v49 = vpop.permute.xlu0 %1029 }
 0x31f   :  { %v865_v40 = vmax.f32 %v844_v59, 0.0  ;;  %v4812_v45 = vadd.f32 %v864_v58, %v227_v55  ;;  %v750_v55 = vpop.permute.xlu1 %749 }
 0x321   :  { %v4816_v47 = vadd.f32 %v865_v40, %v228_v50 }
 0x322   :  { %v848_v3 = vpop.f32.mrb[16].mxu0 }
 0x323   :  { %v877_v4 = vpack.c.bf16 %v4816_v47, %v4812_v45  ;;  %v849_v5 = vadd.f32 %v848_v3, %v740_v48  ;;  %v850_v6 = vpop.f32.mrb[17].mxu0  ;;  %v1015_v35 = vpop.permute.xlu1 %1014 }
 0x324   :  { %v851_v8 = vpop.f32.mrb[18].mxu0 }
 0x325   :  { %v866_v9 = vmax.f32 %v849_v5, 0.0  ;;  %v852_v10 = vadd.f32 %v851_v8, %v745_v7  ;;  %v853_v11 = vpop.f32.mrb[19].mxu0  ;;  %3758 = vmatmul.mubr.msk.bf16.vlgmr.msra.gmra.mrb[24].mxu0 %vm912_vm5, %v877_v4  ;;  %v1040_v5 = vpop.permute.xlu0 %1039 }
 0x327   :  { %v867_v46 = vmax.f32 %v852_v10, 0.0  ;;  %v4823_v44 = vadd.f32 %v866_v9, %v229_v63  ;;  %v4079_v63 = vld [vmem:[%s5411_s30] sm:$0xff]   ;;  %v1025_v38 = vpop.permute.xlu1 %1024 }
 0x329   :  { %v4827_v50 = vadd.f32 %v867_v46, %v230_v1 }
 0x32a   :  { %v856_v12 = vpop.f32.mrb[20].mxu0 }
 0x32b   :  { %v857_v13 = vadd.f32 %v856_v12, %v750_v55  ;;  %v858_v14 = vpop.f32.mrb[21].mxu0  ;;  %v878_v15 = vpack.c.bf16 %v4827_v50, %v4823_v44  ;;  %v1035_v46 = vpop.permute.xlu1 %1034 }
 0x32c   :  { %v859_v16 = vpop.f32.mrb[22].mxu0 }
 0x32d   :  { %v868_v17 = vmax.f32 %v857_v13, 0.0  ;;  %v860_v18 = vpop.f32.mrb[23].mxu0  ;;  %3761 = vmatprep.mubr.msk.bf16.mxu0 %vm912_vm5, %v878_v15 }
 0x32f   :  { %v4833_v56 = vadd.f32 %v868_v17, %v4654_v62 }
 0x331   :  { %v879_v61 = vpack.c.bf16 %v4833_v56, %v4833_v56 }
 0x333   :  { %3762 = vmatmul.mubr.msk.bf16.gmra.mrb[28].mxu0 %vm912_vm5, %v879_v61 }
 0x334   :  { %3773 = vmatprep.mubr.msk.bf16.mxu0 %vm483_vm3, %v4079_v63 }
 0x3f8   :  { %v3759_v1 = vpop.f32.mrb[24].mxu0 }
 0x3f9   :  { %v959_v19 = vpop.f32.mrb[25].mxu0 }
 0x3fa   :  { %v3760_v20 = vpop.f32.mrb[26].mxu0 }
 0x3fb   :  { %v1004_v21 = vpack.c.bf16 %v3760_v20, %v3759_v1  ;;  %v962_v22 = vpop.f32.mrb[27].mxu0 }
 0x3fc   :  { %v1003_v23 = vpack.c.bf16 %v962_v22, %v959_v19 }
 0x3fe   :  { %3765 = vmatprep.subr.bf16.mxu0 %v1003_v23 }
 0x3ff   :  { %3766 = vmatpush3.bf16.msra.mxu0 %v1003_v23 }
 0x400   :  { %3767 = vmatprep.subr.bf16.mxu0 %v1004_v21 }
 0x403   :  { %3768 = vmatpush3.bf16.msra.mxu0 %v1004_v21 }
 0x406   :  { %v3763_v62 = vpop.f32.mrb[28].mxu0 }
 0x407   :  { %v975_v24 = vpop.f32.mrb[29].mxu0  ;;  %v1006_v27 = vpack.c.bf16 %v3763_v62, %v3763_v62 }
 0x408   :  { %v3764_v30 = vpop.f32.mrb[30].mxu0 }
 0x409   :  { %v978_v25 = vpop.f32.mrb[31].mxu0  ;;  %v1073_v28 = vsel %vm523_vm2, %v1006_v27, 0 }
 0x40a   :  { %v1005_v26 = vpack.c.bf16 %v978_v25, %v975_v24 }
 0x40c   :  { %3769 = vmatprep.subr.bf16.mxu0 %v1005_v26 }
 0x40d   :  { %3770 = vmatpush3.bf16.msra.mxu0 %v1005_v26 }
 0x40e   :  { %4039 = vmatprep.subr.msk.bf16.mxu0 %vm523_vm2, %v1006_v27 }
 0x411   :  { %3772 = vmatpush3.bf16.msra.mxu0 %v1073_v28 }
 0x414   :  { %3774 = vmatmul.mubr.msk.bf16.vlgmr.msra.gmra.mrb[32].mxu0 %vm483_vm3, %v4080_v29 }
 0x415   :  { %3777 = vmatprep.mubr.msk.bf16.mxu0 %vm483_vm3, %v4081_v31 }
 0x41c   :  { %3778 = vmatmul.mubr.msk.bf16.gmra.mrb[36].mxu0 %vm483_vm3, %v4082_v32 }
 0x41d   :  { %3789 = vmatprep.mubr.msk.bf16.mxu0 %vm483_vm3, %v4083_v33 }
 0x4e7   :  { %v3775_v37 = vpop.f32.mrb[32].mxu0 }
 0x4e8   :  { %v1118_v39 = vadd.f32 %v3775_v37, %v1020_v36  ;;  %v1109_v43 = vpop.f32.mrb[33].mxu0 }
 0x4e9   :  { %v1110_v51 = vadd.f32 %v1109_v43, %v1010_v34  ;;  %v3776_v52 = vpop.f32.mrb[34].mxu0 }
 0x4ea   :  { %v1141_v53 = vsub.f32 0.0, %v1118_v39  ;;  %v1121_v54 = vadd.f32 %v3776_v52, %v1025_v38  ;;  %v1112_v57 = vpop.f32.mrb[35].mxu0 }
 0x4eb   :  { %v1139_v58 = vsub.f32 0.0, %v1110_v51  ;;  %v1113_v59 = vadd.f32 %v1112_v57, %v1015_v35 }
 0x4ec   :  { %v1150_v60 = vmul.f32 1.442695, %v1141_v53  ;;  %v1142_v40 = vsub.f32 0.0, %v1121_v54 }
 0x4ed   :  { %v1146_v48 = vmul.f32 1.442695, %v1139_v58  ;;  %v1140_v3 = vsub.f32 0.0, %v1113_v59 }
 0x4ee   :  { %4156 = vpow2.f32 %v1150_v60  ;;  %v1152_v4 = vmul.f32 1.442695, %v1142_v40 }
 0x4ef   :  { %4158 = vpow2.f32 %v1146_v48  ;;  %v1148_v6 = vmul.f32 1.442695, %v1140_v3  ;;  %v3779_v7 = vpop.f32.mrb[36].mxu0 }
 0x4f0   :  { %4160 = vpow2.f32 %v1152_v4  ;;  %v1134_v8 = vadd.f32 %v3779_v7, %v1040_v5  ;;  %v1125_v9 = vpop.f32.mrb[37].mxu0 }
 0x4f1   :  { %4162 = vpow2.f32 %v1148_v6  ;;  %v1126_v10 = vadd.f32 %v1125_v9, %v1030_v49  ;;  %v3780_v11 = vpop.f32.mrb[38].mxu0 }
 0x4f2   :  { %v1145_v55 = vsub.f32 0.0, %v1134_v8  ;;  %v1128_v12 = vpop.f32.mrb[39].mxu0 }
 0x4f3   :  { %v1143_v13 = vsub.f32 0.0, %v1126_v10  ;;  %v1129_v14 = vadd.f32 %v1128_v12, %v1035_v46 }
 0x4f4   :  { %v1158_v15 = vmul.f32 1.442695, %v1145_v55 }
 0x4f5   :  { %v1154_v16 = vmul.f32 1.442695, %v1143_v13  ;;  %v1144_v17 = vsub.f32 0.0, %v1129_v14  ;;  %v4084_v14 = vld [vmem:[%s5412_s29 + $0x8] sm:$0xff]  }
 0x4f6   :  { %4164 = vpow2.f32 %v1158_v15  ;;  %v1230_v15 = vpop.permute.xlu0 %1229 }
 0x4f7   :  { %4166 = vpow2.f32 %v1154_v16  ;;  %v1156_v18 = vmul.f32 1.442695, %v1144_v17  ;;  %v1225_v16 = vpop.permute.xlu1 %1224 }
 0x4f8   :  { %v4157_v61 = vpop.eup %4156 }
 0x4f9   :  { %v4159_v63 = vpop.eup %4158  ;;  %v1162_v1 = vadd.f32 1.0, %v4157_v61  ;;  %4168 = vpow2.f32 %v1156_v18 }
 0x4fa   :  { %v4161_v19 = vpop.eup %4160  ;;  %v1160_v20 = vadd.f32 1.0, %v4159_v63  ;;  %v1240_v17 = vpop.permute.xlu0 %1239 }
 0x4fb   :  { %v4163_v21 = vpop.eup %4162  ;;  %4170 = vrcp.f32 %v1162_v1  ;;  %v1163_v22 = vadd.f32 1.0, %v4161_v19  ;;  %v1235_v18 = vpop.permute.xlu1 %1234 }
 0x4fc   :  { %4172 = vrcp.f32 %v1160_v20  ;;  %v1161_v23 = vadd.f32 1.0, %v4163_v21 }
 0x4fd   :  { %4174 = vrcp.f32 %v1163_v22 }
 0x4fe   :  { %4176 = vrcp.f32 %v1161_v23  ;;  %v1250_v22 = vpop.permute.xlu0 %1249 }
 0x500   :  { %v4165_v62 = vpop.eup %4164 }
 0x501   :  { %v4167_v24 = vpop.eup %4166  ;;  %v1166_v30 = vadd.f32 1.0, %v4165_v62 }
 0x502   :  { %v1164_v25 = vadd.f32 1.0, %v4167_v24  ;;  %v1245_v24 = vpop.permute.xlu1 %1244 }
 0x503   :  { %v4169_v26 = vpop.eup %4168  ;;  %4178 = vrcp.f32 %v1166_v30 }
 0x504   :  { %4180 = vrcp.f32 %v1164_v25  ;;  %v1165_v27 = vadd.f32 1.0, %v4169_v26 }
 0x505   :  { %v4171_v28 = vpop.eup %4170 }
 0x506   :  { %v4173_v29 = vpop.eup %4172  ;;  %4182 = vrcp.f32 %v1165_v27  ;;  %v1176_v31 = vmul.f32 %v4171_v28, %v4812_v45 }
 0x507   :  { %v4175_v32 = vpop.eup %4174  ;;  %v1174_v33 = vmul.f32 %v4173_v29, %v4801_v41 }
 0x508   :  { %v4177_v34 = vpop.eup %4176  ;;  %v1177_v35 = vmul.f32 %v4175_v32, %v4816_v47  ;;  %v1183_v36 = vmul.f32 0.999995, %v1176_v31  ;;  %v1260_v32 = vpop.permute.xlu0 %1259 }
 0x509   :  { %v1175_v37 = vmul.f32 %v4177_v34, %v4805_v42  ;;  %v1181_v38 = vmul.f32 0.999995, %v1174_v33 }
 0x50a   :  { %v1184_v39 = vmul.f32 0.999995, %v1177_v35  ;;  %v1190_v43 = vmax.f32 %v1183_v36, 0.0  ;;  %v1255_v36 = vpop.permute.xlu1 %1254 }
 0x50b   :  { %v1182_v49 = vmul.f32 0.999995, %v1175_v37  ;;  %v1188_v51 = vmax.f32 %v1181_v38, 0.0 }
 0x50c   :  { %v1191_v52 = vmax.f32 %v1184_v39, 0.0  ;;  %v1197_v58 = vadd.f32 %v1190_v43, %v4812_v45 }
 0x50d   :  { %v4179_v53 = vpop.eup %4178  ;;  %v1189_v54 = vmax.f32 %v1182_v49, 0.0  ;;  %v1195_v40 = vadd.f32 %v1188_v51, %v4801_v41 }
 0x50e   :  { %v4181_v57 = vpop.eup %4180  ;;  %v1198_v59 = vadd.f32 %v1191_v52, %v4816_v47  ;;  %v1180_v60 = vmul.f32 %v4179_v53, %v4833_v56 }
 0x50f   :  { %v1196_v48 = vadd.f32 %v1189_v54, %v4805_v42  ;;  %v1178_v3 = vmul.f32 %v4181_v57, %v4823_v44 }
 0x510   :  { %v4183_v4 = vpop.eup %4182  ;;  %v1219_v5 = vpack.c.bf16 %v1198_v59, %v1197_v58  ;;  %v1187_v6 = vmul.f32 0.999995, %v1180_v60  ;;  %v4088_v58 = vld [vmem:[%s5373_s7 + $0x8] sm:$0xff]   ;;  %v4089_v59 = vld [vmem:[%s5374_s8] sm:$0xff]   ;;  %v1385_v60 = vpop.permute.xlu1 %1384 }
 0x511   :  { %v1218_v7 = vpack.c.bf16 %v1196_v48, %v1195_v40  ;;  %v1179_v8 = vmul.f32 %v4183_v4, %v4827_v50  ;;  %v1185_v9 = vmul.f32 0.999995, %v1178_v3  ;;  %v1390_v40 = vpop.permute.xlu0 %1389 }
 0x512   :  { %v1194_v11 = vmax.f32 %v1187_v6, 0.0 }
 0x513   :  { %3781 = vmatprep.subr.bf16.mxu0 %v1218_v7  ;;  %v1186_v10 = vmul.f32 0.999995, %v1179_v8  ;;  %v1192_v45 = vmax.f32 %v1185_v9, 0.0 }
 0x514   :  { %3782 = vmatpush3.bf16.msra.mxu0 %v1218_v7  ;;  %v1201_v46 = vadd.f32 %v1194_v11, %v4833_v56  ;;  %v4087_v56 = vld [vmem:[%s5373_s7] sm:$0xff]   ;;  %v1395_v48 = vpop.permute.xlu1 %1394 }
 0x515   :  { %3783 = vmatprep.subr.bf16.mxu0 %v1219_v5  ;;  %v1193_v47 = vmax.f32 %v1186_v10, 0.0  ;;  %v1199_v41 = vadd.f32 %v1192_v45, %v4823_v44  ;;  %v4085_v44 = vld [vmem:[%s5412_s29 + $0x10] sm:$0xff]   ;;  %v1400_v6 = vpop.permute.xlu0 %1399 }
 0x516   :  { %v1221_v12 = vpack.c.bf16 %v1201_v46, %v1201_v46 }
 0x517   :  { %v1200_v42 = vadd.f32 %v1193_v47, %v4827_v50  ;;  %v4086_v50 = vld [vmem:[%s5412_s29 + $0x18] sm:$0xff]  }
 0x518   :  { %3784 = vmatpush3.bf16.msra.mxu0 %v1219_v5  ;;  %v1295_v13 = vsel %vm523_vm2, %v1221_v12, 0 }
 0x519   :  { %v1220_v55 = vpack.c.bf16 %v1200_v42, %v1199_v41 }
 0x51b   :  { %3785 = vmatprep.subr.bf16.mxu0 %v1220_v55 }
 0x51c   :  { %3786 = vmatpush3.bf16.msra.mxu0 %v1220_v55 }
 0x51d   :  { %4040 = vmatprep.subr.msk.bf16.mxu0 %vm523_vm2, %v1221_v12  ;;  %v4090_v12 = vld [vmem:[%s5374_s8 + $0x8] sm:$0xff]  }
 0x520   :  { %3788 = vmatpush3.bf16.msra.mxu0 %v1295_v13  ;;  %v4091_v13 = vld [vmem:[%s5374_s8 + $0x10] sm:$0xff]  }
 0x523   :  { %3790 = vmatmul.mubr.msk.bf16.vlgmr.msra.gmra.mrb[40].mxu0 %vm483_vm3, %v4084_v14  ;;  %v4092_v14 = vld [vmem:[%s5374_s8 + $0x18] sm:$0xff]  }
 0x524   :  { %3793 = vmatprep.mubr.msk.bf16.mxu0 %vm483_vm3, %v4085_v44  ;;  %v1492_v44 = vpop.permute.xlu1 %1491 }
 0x52b   :  { %3794 = vmatmul.mubr.msk.bf16.gmra.mrb[44].mxu0 %vm483_vm3, %v4086_v50  ;;  %v1497_v50 = vpop.permute.xlu0 %1496 }
 0x52c   :  { %3805 = vmatprep.mubr.msk.bf16.mxu0 %vm912_vm5, %v4087_v56  ;;  %v1502_v56 = vpop.permute.xlu1 %1501 }
 0x5f6   :  { %v3791_v61 = vpop.f32.mrb[40].mxu0 }
 0x5f7   :  { %v1331_v63 = vpop.f32.mrb[41].mxu0  ;;  %v4896_v23 = vadd.f32 %v3791_v61, %v1235_v18  ;;  %v1512_v61 = vpop.permute.xlu1 %1511 }
 0x5f8   :  { %v4892_v1 = vadd.f32 %v1331_v63, %v1225_v16  ;;  %v3792_v19 = vpop.f32.mrb[42].mxu0 }
 0x5f9   :  { %v4894_v20 = vadd.f32 %v3792_v19, %v1240_v17  ;;  %v1334_v21 = vpop.f32.mrb[43].mxu0  ;;  %v1364_v27 = vmax.f32 %v4896_v23, 0.0 }
 0x5fa   :  { %v4898_v62 = vadd.f32 %v1334_v21, %v1230_v15  ;;  %v1362_v30 = vmax.f32 %v4892_v1, 0.0  ;;  %v1507_v15 = vpop.permute.xlu0 %1506 }
 0x5fb   :  { %v1365_v25 = vmax.f32 %v4894_v20, 0.0 }
 0x5fc   :  { %v1363_v26 = vmax.f32 %v4898_v62, 0.0 }
 0x5fd   :  { %v1379_v33 = vpack.c.bf16 %v1365_v25, %v1364_v27 }
 0x5fe   :  { %v1378_v28 = vpack.c.bf16 %v1363_v26, %v1362_v30  ;;  %v3795_v29 = vpop.f32.mrb[44].mxu0 }
 0x5ff   :  { %v1347_v31 = vpop.f32.mrb[45].mxu0  ;;  %v4916_v39 = vadd.f32 %v3795_v29, %v1255_v36  ;;  %v1522_v36 = vpop.permute.xlu1 %1521 }
 0x600   :  { %v4912_v34 = vadd.f32 %v1347_v31, %v1245_v24  ;;  %v3796_v35 = vpop.f32.mrb[46].mxu0  ;;  %3797 = vmatprep.subr.bf16.mxu0 %v1378_v28  ;;  %v1517_v24 = vpop.permute.xlu0 %1516 }
 0x601   :  { %v4914_v37 = vadd.f32 %v3796_v35, %v1260_v32  ;;  %v1350_v38 = vpop.f32.mrb[47].mxu0  ;;  %3798 = vmatpush3.bf16.msra.mxu0 %v1378_v28  ;;  %v1368_v53 = vmax.f32 %v4916_v39, 0.0 }
 0x602   :  { %v4918_v43 = vadd.f32 %v1350_v38, %v1250_v22  ;;  %3799 = vmatprep.subr.bf16.mxu0 %v1379_v33  ;;  %v1366_v49 = vmax.f32 %v4912_v34, 0.0  ;;  %v4093_v34 = vld [vmem:[%s5375_s9] sm:$0xff]  }
 0x603   :  { %v1369_v51 = vmax.f32 %v4914_v37, 0.0 }
 0x604   :  { %v1367_v52 = vmax.f32 %v4918_v43, 0.0 }
 0x605   :  { %3800 = vmatpush3.bf16.msra.mxu0 %v1379_v33  ;;  %v1381_v57 = vpack.c.bf16 %v1369_v51, %v1368_v53 }
 0x606   :  { %v1380_v54 = vpack.c.bf16 %v1367_v52, %v1366_v49 }
 0x608   :  { %3801 = vmatprep.subr.bf16.mxu0 %v1380_v54 }
 0x609   :  { %3802 = vmatpush3.bf16.msra.mxu0 %v1380_v54 }
 0x60a   :  { %3803 = vmatprep.subr.bf16.mxu0 %v1381_v57 }
 0x60d   :  { %3804 = vmatpush3.bf16.msra.mxu0 %v1381_v57 }
 0x610   :  { %3806 = vmatmul.mubr.msk.bf16.vlgmr.msra.gmra.mrb[48].mxu0 %vm912_vm5, %v4088_v58 }
 0x611   :  { %3813 = vmatprep.mubr.msk.bf16.mxu0 %vm148_vm0, %v4089_v59 }
 0x6e3   :  { %v3807_v3 = vpop.f32.mrb[48].mxu0 }
 0x6e4   :  { %v1461_v4 = vadd.f32 %v3807_v3, %v1395_v48  ;;  %v1452_v5 = vpop.f32.mrb[49].mxu0 }
 0x6e5   :  { %v1453_v7 = vadd.f32 %v1452_v5, %v1385_v60  ;;  %v3808_v8 = vpop.f32.mrb[50].mxu0 }
 0x6e6   :  { %v1464_v9 = vadd.f32 %v3808_v8, %v1400_v6  ;;  %v1455_v10 = vpop.f32.mrb[51].mxu0  ;;  %v1469_v11 = vmax.f32 %v1461_v4, 0.0 }
 0x6e7   :  { %v1456_v45 = vadd.f32 %v1455_v10, %v1390_v40  ;;  %v1467_v41 = vmax.f32 %v1453_v7, 0.0  ;;  %v1527_v40 = vpop.permute.xlu0 %1526 }
 0x6e8   :  { %v1470_v47 = vmax.f32 %v1464_v9, 0.0 }
 0x6e9   :  { %v1468_v42 = vmax.f32 %v1456_v45, 0.0 }
 0x6ea   :  { %v1488_v46 = vpack.c.bf16 %v1470_v47, %v1469_v11 }
 0x6eb   :  { %v1487_v55 = vpack.c.bf16 %v1468_v42, %v1467_v41 }
 0x6ed   :  { %3809 = vmatprep.subr.bf16.mxu0 %v1487_v55 }
 0x6ee   :  { %3810 = vmatpush3.bf16.msra.mxu0 %v1487_v55  ;;  %v4095_v55 = vld [vmem:[%s5375_s9 + $0x10] sm:$0xff]  }
 0x6ef   :  { %3811 = vmatprep.subr.bf16.mxu0 %v1488_v46 }
 0x6f2   :  { %3812 = vmatpush3.bf16.msra.mxu0 %v1488_v46  ;;  %v4094_v46 = vld [vmem:[%s5375_s9 + $0x8] sm:$0xff]  }
 0x6f5   :  { %3814 = vmatmul.mubr.msk.bf16.vlgmr.msra.gmra.mrb[52].mxu0 %vm148_vm0, %v4090_v12  ;;  %v4096_v12 = vld [vmem:[%s5375_s9 + $0x18] sm:$0xff]  }
 0x6f6   :  { %3817 = vmatprep.mubr.msk.bf16.mxu0 %vm148_vm0, %v4091_v13  ;;  %v4098_v13 = vld [vmem:[%s5377_s20] sm:$0xff]  }
 0x6fd   :  { %3818 = vmatmul.mubr.msk.bf16.gmra.mrb[56].mxu0 %vm148_vm0, %v4092_v14  ;;  %v4099_v14 = vld [vmem:[%s5377_s20 + $0x8] sm:$0xff]  }
 0x6fe   :  { %3845 = vmatprep.mubr.msk.bf16.mxu0 %vm912_vm5, %v4093_v34 }
 0x7c8   :  { %v3815_v16 = vpop.f32.mrb[52].mxu0 }
 0x7c9   :  { %v1604_v17 = vadd.f32 %v3815_v16, %v1502_v56  ;;  %v1595_v18 = vpop.f32.mrb[53].mxu0 }
 0x7ca   :  { %v1596_v63 = vadd.f32 %v1595_v18, %v1492_v44  ;;  %v3816_v19 = vpop.f32.mrb[54].mxu0  ;;  %v1746_v44 = vpop.permute.xlu1 %1745 }
 0x7cb   :  { %v1607_v21 = vadd.f32 %v3816_v19, %v1507_v15  ;;  %v1598_v22 = vpop.f32.mrb[55].mxu0  ;;  %v1628_v31 = vmax.f32 %v1604_v17, 0.0 }
 0x7cc   :  { %v1626_v28 = vmax.f32 %v1596_v63, 0.0  ;;  %v1599_v29 = vadd.f32 %v1598_v22, %v1497_v50  ;;  %v1751_v50 = vpop.permute.xlu0 %1750 }
 0x7cd   :  { %v1629_v32 = vmax.f32 %v1607_v21, 0.0  ;;  %v4966_v58 = vadd.f32 %v1628_v31, %v1364_v27 }
 0x7ce   :  { %v1627_v33 = vmax.f32 %v1599_v29, 0.0  ;;  %v4958_v38 = vadd.f32 %v1626_v28, %v1362_v30  ;;  %v1756_v56 = vpop.permute.xlu1 %1755 }
 0x7cf   :  { %v4954_v35 = vadd.f32 %v1629_v32, %v1365_v25 }
 0x7d0   :  { %v4962_v54 = vadd.f32 %v1627_v33, %v1363_v26  ;;  %v3819_v57 = vpop.f32.mrb[56].mxu0  ;;  %v1761_v15 = vpop.permute.xlu0 %1760 }
 0x7d1   :  { %v1620_v59 = vadd.f32 %v3819_v57, %v1522_v36  ;;  %v1611_v60 = vpop.f32.mrb[57].mxu0  ;;  %v1643_v1 = vpack.c.bf16 %v4954_v35, %v4966_v58 }
 0x7d2   :  { %v1612_v20 = vadd.f32 %v1611_v60, %v1512_v61  ;;  %v3820_v25 = vpop.f32.mrb[58].mxu0  ;;  %v1642_v48 = vpack.c.bf16 %v4962_v54, %v4958_v38  ;;  %v1766_v61 = vpop.permute.xlu1 %1765 }
 0x7d3   :  { %v1623_v30 = vadd.f32 %v3820_v25, %v1527_v40  ;;  %v1614_v62 = vpop.f32.mrb[59].mxu0  ;;  %v1632_v23 = vmax.f32 %v1620_v59, 0.0 }
 0x7d4   :  { %v1630_v26 = vmax.f32 %v1612_v20, 0.0  ;;  %v1615_v3 = vadd.f32 %v1614_v62, %v1517_v24  ;;  %3829 = vmatprep.mubr.msk.bf16.mxu1 %vm912_vm5, %v1642_v48  ;;  %v1771_v28 = vpop.permute.xlu0 %1770 }
 0x7d5   :  { %v1633_v27 = vmax.f32 %v1623_v30, 0.0  ;;  %3830 = vmatmul.mubr.msk.bf16.vlgmr.msra.gmra.mrb[52].mxu1 %vm912_vm5, %v1643_v1  ;;  %v4988_v8 = vadd.f32 %v1632_v23, %v1368_v53 }
 0x7d6   :  { %v1631_v4 = vmax.f32 %v1615_v3, 0.0  ;;  %v4980_v6 = vadd.f32 %v1630_v26, %v1366_v49  ;;  %v1776_v60 = vpop.permute.xlu1 %1775 }
 0x7d7   :  { %v4976_v5 = vadd.f32 %v1633_v27, %v1369_v51 }
 0x7d8   :  { %v4984_v7 = vadd.f32 %v1631_v4, %v1367_v52  ;;  %v1781_v1 = vpop.permute.xlu0 %1780 }
 0x7d9   :  { %v1645_v37 = vpack.c.bf16 %v4976_v5, %v4988_v8 }
 0x7da   :  { %v1644_v9 = vpack.c.bf16 %v4984_v7, %v4980_v6 }
 0x7dc   :  { %3833 = vmatprep.mubr.msk.bf16.mxu1 %vm912_vm5, %v1644_v9 }
 0x7dd   :  { %3834 = vmatmul.mubr.msk.bf16.gmra.mrb[56].mxu1 %vm912_vm5, %v1645_v37 }
 0x7de   :  { %3861 = vmatprep.mubr.msk.bf16.mxu1 %vm4218_vm1, %v4217_v2 }
 0x8a8   :  { %v3831_v39 = vpop.f32.mrb[52].mxu1 }
 0x8a9   :  { %v1692_v43 = vpop.f32.mrb[53].mxu1 }
 0x8aa   :  { %v3832_v49 = vpop.f32.mrb[54].mxu1 }
 0x8ab   :  { %v1740_v51 = vpack.c.bf16 %v3832_v49, %v3831_v39  ;;  %v1695_v52 = vpop.f32.mrb[55].mxu1 }
 0x8ac   :  { %v1739_v53 = vpack.c.bf16 %v1695_v52, %v1692_v43 }
 0x8ae   :  { %3837 = vmatprep.subr.bf16.mxu0 %v1739_v53 }
 0x8af   :  { %3838 = vmatpush3.bf16.msra.mxu0 %v1739_v53 }
 0x8b0   :  { %v3835_v10 = vpop.f32.mrb[56].mxu1  ;;  %3839 = vmatprep.subr.bf16.mxu0 %v1740_v51 }
 0x8b1   :  { %v1708_v45 = vpop.f32.mrb[57].mxu1 }
 0x8b2   :  { %v3836_v11 = vpop.f32.mrb[58].mxu1 }
 0x8b3   :  { %v1742_v47 = vpack.c.bf16 %v3836_v11, %v3835_v10  ;;  %v1711_v41 = vpop.f32.mrb[59].mxu1  ;;  %3840 = vmatpush3.bf16.msra.mxu0 %v1740_v51 }
 0x8b4   :  { %v1741_v42 = vpack.c.bf16 %v1711_v41, %v1708_v45 }
 0x8b6   :  { %3841 = vmatprep.subr.bf16.mxu0 %v1741_v42 }
 0x8b7   :  { %3842 = vmatpush3.bf16.msra.mxu0 %v1741_v42 }
 0x8b8   :  { %3843 = vmatprep.subr.bf16.mxu0 %v1742_v47 }
 0x8bb   :  { %3844 = vmatpush3.bf16.msra.mxu0 %v1742_v47 }
 0x8bc   :  { %3865 = vmatprep.subr.bf16.mxu0 %v4217_v2 }
 0x8be   :  { %3846 = vmatmul.mubr.msk.bf16.vlgmr.msra.gmra.mrb[60].mxu0 %vm912_vm5, %v4094_v46 }
 0x8bf   :  { %3849 = vmatprep.mubr.msk.bf16.mxu0 %vm912_vm5, %v4095_v55  ;;  %3866 = vmatpush3.bf16.msra.mxu0 %v4098_v13 }
 0x8c0   :  { %3867 = vmatprep.subr.bf16.mxu0 %v4217_v2 }
 0x8c3   :  { %3868 = vmatpush3.bf16.msra.mxu0 %v4099_v14 }
 0x8c4   :  { %3869 = vmatprep.subr.bf16.mxu0 %v4217_v2 }
 0x8c6   :  { %3850 = vmatmul.mubr.msk.bf16.gmra.mrb[64].mxu0 %vm912_vm5, %v4096_v12 }
 0x8c7   :  { %3873 = vmatprep.mubr.msk.bf16.mxu0 %vm4218_vm1, %v4217_v2 }
 0x991   :  { %v3847_v16 = vpop.f32.mrb[60].mxu0 }
 0x992   :  { %v1858_v17 = vadd.f32 %v3847_v16, %v1756_v56  ;;  %v1849_v18 = vpop.f32.mrb[61].mxu0 }
 0x993   :  { %v1850_v63 = vadd.f32 %v1849_v18, %v1746_v44  ;;  %v3848_v19 = vpop.f32.mrb[62].mxu0 }
 0x994   :  { %v1882_v21 = vsub.f32 0.0, %v1858_v17  ;;  %v1861_v22 = vadd.f32 %v3848_v19, %v1761_v15  ;;  %v1852_v24 = vpop.f32.mrb[63].mxu0 }
 0x995   :  { %v1880_v29 = vsub.f32 0.0, %v1850_v63  ;;  %v1853_v31 = vadd.f32 %v1852_v24, %v1751_v50 }
 0x996   :  { %v1892_v32 = vmul.f32 1.442695, %v1882_v21  ;;  %v1883_v33 = vsub.f32 0.0, %v1861_v22 }
 0x997   :  { %v1888_v36 = vmul.f32 1.442695, %v1880_v29  ;;  %v1881_v57 = vsub.f32 0.0, %v1853_v31 }
 0x998   :  { %4184 = vpow2.f32 %v1892_v32  ;;  %v1894_v59 = vmul.f32 1.442695, %v1883_v33 }
 0x999   :  { %4186 = vpow2.f32 %v1888_v36  ;;  %v1890_v40 = vmul.f32 1.442695, %v1881_v57  ;;  %v3851_v20 = vpop.f32.mrb[64].mxu0 }
 0x99a   :  { %4188 = vpow2.f32 %v1894_v59  ;;  %v1874_v25 = vadd.f32 %v3851_v20, %v1776_v60  ;;  %v1865_v48 = vpop.f32.mrb[65].mxu0 }
 0x99b   :  { %4190 = vpow2.f32 %v1890_v40  ;;  %v1866_v30 = vadd.f32 %v1865_v48, %v1766_v61  ;;  %v3852_v62 = vpop.f32.mrb[66].mxu0 }
 0x99c   :  { %v1886_v26 = vsub.f32 0.0, %v1874_v25  ;;  %v1877_v3 = vadd.f32 %v3852_v62, %v1781_v1  ;;  %v1868_v23 = vpop.f32.mrb[67].mxu0 }
 0x99d   :  { %v1884_v27 = vsub.f32 0.0, %v1866_v30  ;;  %v1869_v4 = vadd.f32 %v1868_v23, %v1771_v28 }
 0x99e   :  { %v1900_v9 = vmul.f32 1.442695, %v1886_v26  ;;  %v1887_v37 = vsub.f32 0.0, %v1877_v3 }
 0x99f   :  { %v1896_v34 = vmul.f32 1.442695, %v1884_v27  ;;  %v1885_v39 = vsub.f32 0.0, %v1869_v4 }
 0x9a0   :  { %4192 = vpow2.f32 %v1900_v9  ;;  %v1902_v43 = vmul.f32 1.442695, %v1887_v37 }
 0x9a1   :  { %4194 = vpow2.f32 %v1896_v34  ;;  %v1898_v49 = vmul.f32 1.442695, %v1885_v39 }
 0x9a2   :  { %v4185_v51 = vpop.eup %4184  ;;  %4196 = vpow2.f32 %v1902_v43 }
 0x9a3   :  { %v4187_v52 = vpop.eup %4186  ;;  %v1906_v53 = vadd.f32 1.0, %v4185_v51  ;;  %4198 = vpow2.f32 %v1898_v49 }
 0x9a4   :  { %v4189_v10 = vpop.eup %4188  ;;  %v1904_v45 = vadd.f32 1.0, %v4187_v52 }
 0x9a5   :  { %v4191_v11 = vpop.eup %4190  ;;  %4200 = vrcp.f32 %v1906_v53  ;;  %v1907_v47 = vadd.f32 1.0, %v4189_v10  ;;  %v4097_v53 = vld [vmem:[%s5376_s10] sm:$0xff]  }
 0x9a6   :  { %4202 = vrcp.f32 %v1904_v45  ;;  %v1905_v41 = vadd.f32 1.0, %v4191_v11  ;;  %v1968_v11 = vpop.permute.xlu0 %1967 }
 0x9a7   :  { %4204 = vrcp.f32 %v1907_v47 }
 0x9a8   :  { %4206 = vrcp.f32 %v1905_v41 }
 0x9aa   :  { %v4193_v42 = vpop.eup %4192 }
 0x9ab   :  { %v4195_v46 = vpop.eup %4194  ;;  %v1910_v55 = vadd.f32 1.0, %v4193_v42 }
 0x9ac   :  { %v4197_v12 = vpop.eup %4196  ;;  %v1908_v13 = vadd.f32 1.0, %v4195_v46 }
 0x9ad   :  { %v4199_v14 = vpop.eup %4198  ;;  %4208 = vrcp.f32 %v1910_v55  ;;  %v1911_v44 = vadd.f32 1.0, %v4197_v12 }
 0x9ae   :  { %4210 = vrcp.f32 %v1908_v13  ;;  %v1909_v50 = vadd.f32 1.0, %v4199_v14  ;;  %v4102_v13 = vld [vmem:[%s5378_s11] sm:$0xff]  }
 0x9af   :  { %v4201_v56 = vpop.eup %4200  ;;  %4212 = vrcp.f32 %v1911_v44  ;;  %v2249_v14 = vld [vmem:[%s5379_s1] sm:$0xff]  ;;  %v2250_v44 = vld [vmem:[%s5379_s1 + $0x8] sm:$0xff] }
 0x9b0   :  { %v4203_v15 = vpop.eup %4202  ;;  %4214 = vrcp.f32 %v1909_v50  ;;  %v1922_v16 = vmul.f32 %v4201_v56, %v4966_v58  ;;  %v2251_v50 = vld [vmem:[%s5379_s1 + $0x10] sm:$0xff]  ;;  %v2255_v56 = vpack.c.bf16 %v2250_v44, %v2249_v14 }
 0x9b1   :  { %v4205_v17 = vpop.eup %4204  ;;  %v1920_v18 = vmul.f32 %v4203_v15, %v4958_v38  ;;  %v2252_v15 = vld [vmem:[%s5379_s1 + $0x18] sm:$0xff] }
 0x9b2   :  { %v4207_v61 = vpop.eup %4206  ;;  %v1923_v63 = vmul.f32 %v4205_v17, %v4954_v35  ;;  %v1930_v19 = vmul.f32 0.999995, %v1922_v16  ;;  %v2256_v16 = vpack.c.bf16 %v2252_v15, %v2251_v50  ;;  %v4104_v17 = vld [vmem:[%s5380_s13] sm:$0xff]  }
 0x9b3   :  { %v1921_v21 = vmul.f32 %v4207_v61, %v4962_v54  ;;  %v1928_v22 = vmul.f32 0.999995, %v1920_v18 }
 0x9b4   :  { %v1931_v24 = vmul.f32 0.999995, %v1923_v63  ;;  %v1938_v28 = vmax.f32 %v1930_v19, 0.0 }
 0x9b5   :  { %v1929_v29 = vmul.f32 0.999995, %v1921_v21  ;;  %v1936_v31 = vmax.f32 %v1928_v22, 0.0  ;;  %v4103_v22 = vld [vmem:[%s5378_s11 + $0x8] sm:$0xff]  }
 0x9b6   :  { %v1939_v32 = vmax.f32 %v1931_v24, 0.0  ;;  %v1946_v59 = vadd.f32 %v1938_v28, %v4966_v58 }
 0x9b7   :  { %v4209_v33 = vpop.eup %4208  ;;  %v1937_v36 = vmax.f32 %v1929_v29, 0.0  ;;  %v1944_v25 = vadd.f32 %v1936_v31, %v4958_v38 }
 0x9b8   :  { %v4211_v57 = vpop.eup %4210  ;;  %v1947_v60 = vadd.f32 %v1939_v32, %v4954_v35  ;;  %v1926_v40 = vmul.f32 %v4209_v33, %v4988_v8 }
 0x9b9   :  { %v4213_v20 = vpop.eup %4212  ;;  %v1945_v48 = vadd.f32 %v1937_v36, %v4962_v54  ;;  %v1924_v1 = vmul.f32 %v4211_v57, %v4980_v6 }
 0x9ba   :  { %v4215_v30 = vpop.eup %4214  ;;  %v1957_v62 = vpack.c.bf16 %v1947_v60, %v1946_v59  ;;  %v1927_v26 = vmul.f32 %v4213_v20, %v4976_v5  ;;  %v1934_v3 = vmul.f32 0.999995, %v1926_v40  ;;  %v2115_v59 = vpop.permute.xlu0 %2114 }
 0x9bb   :  { %v1956_v23 = vpack.c.bf16 %v1945_v48, %v1944_v25  ;;  %v1925_v27 = vmul.f32 %v4215_v30, %v4984_v7  ;;  %v1932_v58 = vmul.f32 0.999995, %v1924_v1 }
 0x9bc   :  { %v1935_v4 = vmul.f32 0.999995, %v1927_v26  ;;  %v1942_v35 = vmax.f32 %v1934_v3, 0.0 }
 0x9bd   :  { %3854 = vmatpush3.bf16.msra.mxu1 %v1956_v23  ;;  %v1933_v9 = vmul.f32 0.999995, %v1925_v27  ;;  %v1940_v37 = vmax.f32 %v1932_v58, 0.0 }
 0x9be   :  { %3855 = vmatprep.subr.bf16.mxu1 %v4217_v2  ;;  %v1943_v38 = vmax.f32 %v1935_v4, 0.0  ;;  %v1950_v34 = vadd.f32 %v1942_v35, %v4988_v8  ;;  %v2125_v48 = vpop.permute.xlu0 %2124 }
 0x9bf   :  { %v1941_v54 = vmax.f32 %v1933_v9, 0.0  ;;  %v1948_v43 = vadd.f32 %v1940_v37, %v4980_v6  ;;  %v4101_v6 = vld [vmem:[%s5377_s20 + $0x18] sm:$0xff]   ;;  %v2198_v37 = vld [vmem:[%s5381_s12] sm:$0xf] }
 0x9c0   :  { %v1951_v39 = vadd.f32 %v1943_v38, %v4976_v5  ;;  %v4100_v5 = vld [vmem:[%s5377_s20 + $0x10] sm:$0xff]   ;;  %v2308_v38 = vld [vmem:[%s5382_s14] sm:$0xf] }
 0x9c1   :  { %3856 = vmatpush3.bf16.msra.mxu1 %v1957_v62  ;;  %v1949_v49 = vadd.f32 %v1941_v54, %v4984_v7  ;;  %3870 = vmatpush3.bf16.msra.mxu0 %v4100_v5  ;;  %v1963_v7 = vpop.permute.xlu1 %1962 }
 0x9c2   :  { %3857 = vmatprep.subr.bf16.mxu1 %v4217_v2  ;;  %v1959_v51 = vpack.c.bf16 %v1951_v39, %v1950_v34  ;;  %3871 = vmatprep.subr.bf16.mxu0 %v4217_v2  ;;  %v2204_v54 = vpop.permute.xlu0 %2203 }
 0x9c3   :  { %v1958_v52 = vpack.c.bf16 %v1949_v49, %v1948_v43 }
 0x9c5   :  { %3858 = vmatpush3.bf16.msra.mxu1 %v1958_v52  ;;  %3872 = vmatpush3.bf16.msra.mxu0 %v4101_v6  ;;  %v2110_v57 = vpop.permute.xlu1 %2109 }
 0x9c6   :  { %3859 = vmatprep.subr.bf16.mxu1 %v4217_v2  ;;  %3891 = vmatprep.subr.bf16.mxu0 %v4217_v2 }
 0x9c9   :  { %3860 = vmatpush3.bf16.msra.mxu1 %v1959_v51  ;;  %v2120_v60 = vpop.permute.xlu1 %2119 }
 0x9cc   :  { %3862 = vmatmul.mubr.msk.bf16.vlgmr.msra.gmra.mrb[60].mxu1 %vm912_vm5, %v4097_v53 }
 0x9cd   :  { %3879 = vmatprep.mubr.msk.bf16.mxu1 %vm2137_vm6, %v4102_v13 }
 0xa9f   :  { %v2012_v8 = vpop.f32.mrb[60].mxu1 }
 0xaa0   :  { %v2013_v10 = vadd.f32 %v2012_v8, %v1963_v7  ;;  %v3863_v45 = vpop.f32.mrb[61].mxu1 }
 0xaa1   :  { %v2015_v47 = vpop.f32.mrb[62].mxu1  ;;  %v2355_v45 = vld [vmem:[%s5384_s15] sm:$0x3] }
 0xaa2   :  { %v2016_v41 = vadd.f32 %v2015_v47, %v1968_v11  ;;  %v3864_v42 = vpop.f32.mrb[63].mxu1  ;;  %v2019_v46 = vmax.f32 %v2013_v10, 0.0  ;;  %v4105_v11 = vld [vmem:[%s5385_s21] sm:$0xff]   ;;  %v4107_v47 = vld [vmem:[%s5385_s21 + $0x8] sm:$0xff]  }
 0xaa3   :  { %v2360_v42 = vpop.permute.xlu1 %2359 }
 0xaa4   :  { %v2020_v55 = vmax.f32 %v2016_v41, 0.0  ;;  %v4109_v41 = vld [vmem:[%s5385_s21 + $0x10] sm:$0xff]  }
 0xaa6   :  { %v2021_v12 = vpack.c.bf16 %v2020_v55, %v2019_v46 }
 0xaa8   :  { %3874 = vmatmul.mubr.msk.bf16.vlgmr.msra.gmra.mrb[68].mxu0 %vm912_vm5, %v2021_v12  ;;  %v4219_v12 = vmov 65535  }
 0xaa9   :  { %3895 = vmatprep.mubr.msk.bf16.mxu0 %vm4218_vm1, %v4217_v2  ;;  %3892 = vmatpush3.bf16.msra.mxu0 %v2255_v56  ;;  %v2424_v13 = vsel %vm2423_vm9, 4294967295, %v4219_v12 }
 0xaaa   :  { %3893 = vmatprep.subr.bf16.mxu0 %v4217_v2  ;;  %v2425_v15 = vsel %vm523_vm2, %v2424_v13, 0 }
 0xaad   :  { %3894 = vmatpush3.bf16.msra.mxu0 %v2256_v16 }
 0xaae   :  { %3905 = vmatprep.subr.bf16.mxu0 %v4217_v2 }
 0xab0   :  { %3896 = vmatmul.mubr.msk.bf16.vlgmr.msra.gmra.mrb[72].mxu0 %vm148_vm0, %v4104_v17 }
 0xab1   :  { %3907 = vmatprep.mubr.msk.bf16.mxu0 %vm4218_vm1, %v4217_v2 }
 0xb7b   :  { %v2091_v18 = vpop.f32.mrb[68].mxu0 }
 0xb7c   :  { %v3875_v61 = vpop.f32.mrb[69].mxu0 }
 0xb7d   :  { %v2094_v63 = vpop.f32.mrb[70].mxu0  ;;  %v4106_v61 = vld [vmem:[%s5385_s21 + $0x20] sm:$0xff]  }
 0xb7e   :  { %v2106_v19 = vpack.c.bf16 %v2094_v63, %v2091_v18  ;;  %v3876_v21 = vpop.f32.mrb[71].mxu0  ;;  %v2412_v18 = vld [vmem:[%s5386_s16] sm:$0xf]  ;;  %v4108_v63 = vld [vmem:[%s5385_s21 + $0x28] sm:$0xff]  }
 0xb7f   :  { %v4111_v21 = vld [vmem:[%s5385_s21 + $0x18] sm:$0xff]  }
 0xb80   :  { %3877 = vmatprep.subr.bf16.mxu1 %v2106_v19 }
 0xb81   :  { %3878 = vmatpush3.bf16.msra.mxu1 %v2106_v19  ;;  %v4110_v19 = vld [vmem:[%s5385_s21 + $0x30] sm:$0xff]  }
 0xb82   :  { %3883 = vmatprep.subr.bf16.mxu1 %v4217_v2 }
 0xb83   :  { %v2299_v24 = vpop.f32.mrb[72].mxu0 }
 0xb84   :  { %3880 = vmatmul.mubr.msk.bf16.vlgmr.msra.gmra.mrb[64].mxu1 %vm2137_vm6, %v4103_v22  ;;  %v3897_v28 = vpop.f32.mrb[73].mxu0  ;;  %v2306_v29 = vmax.f32 %v2299_v24, 0.0  ;;  %v4112_v22 = vld [vmem:[%s5385_s21 + $0x38] sm:$0xff]   ;;  %v2417_v24 = vpop.permute.xlu1 %2416 }
 0xb85   :  { %3887 = vmatprep.mubr.msk.bf16.mxu1 %vm4218_vm1, %v4217_v2  ;;  %v2302_v31 = vpop.f32.mrb[74].mxu0 }
 0xb86   :  { %v2307_v32 = vmax.f32 %v2302_v31, 0.0  ;;  %v3898_v33 = vpop.f32.mrb[75].mxu0 }
 0xb87   :  { %v4113_v33 = vld [vmem:[%s5385_s21 + $0x40] sm:$0xff]  }
 0xb88   :  { %v2309_v36 = vpack.c.bf16 %v2307_v32, %v2306_v29 }
 0xc57   :  { %v3881_v40 = vpop.f32.mrb[64].mxu1 }
 0xc58   :  { %v2187_v20 = vadd.f32 %v3881_v40, %v2120_v60  ;;  %v2178_v25 = vpop.f32.mrb[65].mxu1  ;;  %v4115_v60 = vld [vmem:[%s5385_s21 + $0x48] sm:$0xff]  }
 0xc59   :  { %v2179_v1 = vadd.f32 %v2178_v25, %v2110_v57  ;;  %v3882_v30 = vpop.f32.mrb[66].mxu1  ;;  %v4116_v40 = vld [vmem:[%s5385_s21 + $0x68] sm:$0xff]   ;;  %v4118_v25 = vld [vmem:[%s5385_s21 + $0x70] sm:$0xff]  }
 0xc5a   :  { %v2190_v62 = vadd.f32 %v3882_v30, %v2125_v48  ;;  %v2181_v26 = vpop.f32.mrb[67].mxu1  ;;  %v2195_v23 = vmax.f32 %v2187_v20, 0.0  ;;  %v4117_v20 = vld [vmem:[%s5385_s21 + $0x50] sm:$0xff]   ;;  %v4119_v48 = vld [vmem:[%s5385_s21 + $0x58] sm:$0xff]   ;;  %v4121_v30 = vld [vmem:[%s5385_s21 + $0x80] sm:$0xff]  }
 0xc5b   :  { %v2182_v3 = vadd.f32 %v2181_v26, %v2115_v59  ;;  %v2193_v58 = vmax.f32 %v2179_v1, 0.0  ;;  %v4120_v1 = vld [vmem:[%s5385_s21 + $0x78] sm:$0xff]   ;;  %v4123_v26 = vld [vmem:[%s5385_s21 + $0x88] sm:$0xff]  }
 0xc5c   :  { %v2196_v27 = vmax.f32 %v2190_v62, 0.0  ;;  %v4122_v62 = vld [vmem:[%s5385_s21 + $0xa0] sm:$0xff]  }
 0xc5d   :  { %v2194_v4 = vmax.f32 %v2182_v3, 0.0  ;;  %v4124_v3 = vld [vmem:[%s5385_s21 + $0xa8] sm:$0xff]  }
 0xc5e   :  { %v2200_v35 = vpack.c.bf16 %v2196_v27, %v2195_v23  ;;  %v4125_v23 = vld [vmem:[%s5385_s21 + $0x90] sm:$0xff]  }
 0xc5f   :  { %v2199_v9 = vpack.c.bf16 %v2194_v4, %v2193_v58  ;;  %v4126_v27 = vld [vmem:[%s5385_s21 + $0xb0] sm:$0xff]   ;;  %v4127_v58 = vld [vmem:[%s5385_s21 + $0x98] sm:$0xff]  }
 0xc60   :  { %v4128_v4 = vld [vmem:[%s5385_s21 + $0xb8] sm:$0xff]  }
 0xc61   :  { %3884 = vmatpush3.bf16.msra.mxu1 %v2199_v9  ;;  %v4130_v9 = vld [vmem:[%s5385_s21 + $0xe0] sm:$0xff]  }
 0xc62   :  { %3885 = vmatprep.subr.bf16.mxu1 %v4217_v2 }
 0xc65   :  { %3886 = vmatpush3.bf16.msra.mxu1 %v2200_v35  ;;  %v4129_v35 = vld [vmem:[%s5385_s21 + $0xc0] sm:$0xff]  }
 0xc66   :  { %3899 = vmatprep.subr.bf16.mxu1 %v4217_v2 }
 0xc68   :  { %3888 = vmatmul.mubr.msk.bf16.vlgmr.msra.gmra.mrb[68].mxu1 %vm148_vm0, %v2198_v37  ;;  %v4131_v37 = vld [vmem:[%s5385_s21 + $0xc8] sm:$0xff]  }
 0xc69   :  { %3900 = vmatpush3.bf16.msra.mxu1 %v2309_v36  ;;  %3901 = vmatprep.mubr.msk.bf16.mxu1 %vm4218_vm1, %v4217_v2  ;;  %v4114_v36 = vld [vmem:[%s5385_s21 + $0x60] sm:$0xff]  }
 0xc6a   :  { %3911 = vmatprep.subr.bf16.mxu1 %v4217_v2 }
 0xc70   :  { %3902 = vmatmul.mubr.msk.bf16.vlgmr.msra.gmra.mrb[72].mxu1 %vm2137_vm6, %v2308_v38  ;;  %v4132_v38 = vld [vmem:[%s5385_s21 + $0xe8] sm:$0xff]  }
 0xc71   :  { %3913 = vmatprep.mubr.msk.bf16.mxu1 %vm4218_vm1, %v4217_v2 }
 0xd3b   :  { %v2243_v34 = vpop.f32.mrb[68].mxu1 }
 0xd3c   :  { %v5105_v39 = vadd.f32 %v2243_v34, %v2204_v54  ;;  %v3889_v43 = vpop.f32.mrb[69].mxu1  ;;  %v4133_v54 = vld [vmem:[%s5385_s21 + $0xd0] sm:$0xff]  }
 0xd3d   :  { %v2246_v49 = vpop.f32.mrb[70].mxu1  ;;  %v4134_v34 = vld [vmem:[%s5385_s21 + $0xf0] sm:$0xff]   ;;  %v4136_v43 = vld [vmem:[%s5385_s21 + $0xf8] sm:$0xff]  }
 0xd3e   :  { %3347 = vst.msk [vmem:[%s5383_s23] sm:$0xff] %vm912_vm5, %v5105_v39  ;;  %v3890_v51 = vpop.f32.mrb[71].mxu1  ;;  %v4137_v49 = vld [vmem:[%s5385_s21 + $0x100] sm:$0xff]  }
 0xd3f   :  { %v4138_v51 = vld [vmem:[%s5385_s21 + $0x108] sm:$0xff]  }
 0xd43   :  { %v2347_v52 = vpop.f32.mrb[72].mxu1 }
 0xd44   :  { %v2353_v53 = vmax.f32 %v2347_v52, 0.0  ;;  %v3903_v5 = vpop.f32.mrb[73].mxu1  ;;  %v4139_v52 = vld [vmem:[%s5385_s21 + $0x110] sm:$0xff]  }
 0xd45   :  { %v2350_v6 = vpop.f32.mrb[74].mxu1  ;;  %v4141_v5 = vld [vmem:[%s5387_s17 + $0x4] ss:$8 sps:$4 sm:$0xff]  }
 0xd46   :  { %v2356_v7 = vpack.c.bf16 %v2353_v53, %v2353_v53  ;;  %v3904_v8 = vpop.f32.mrb[75].mxu1  ;;  %v4140_v53 = vld [vmem:[%s5385_s21 + $0x118] sm:$0xff]  }
 0xd48   :  { %v2368_v10 = vsel %vm2366_vm7, %v2356_v7, 0 }
 0xd49   :  { %3906 = vmatpush3.bf16.msra.mxu0 %v2368_v10 }
 0xd4a   :  { %3917 = vmatprep.subr.bf16.mxu0 %v4217_v2 }
 0xd4c   :  { %3908 = vmatmul.mubr.msk.bf16.vlgmr.msra.gmra.mrb[76].mxu0 %vm2362_vm8, %v2355_v45 }
 0xd4d   :  { %3925 = vmatprep.mubr.msk.bf16.mxu0 %vm4218_vm1, %v4217_v2  ;;  %3918 = vmatpush3.bf16.msra.mxu0 %v4105_v11 }
 0xd4e   :  { %3919 = vmatprep.subr.bf16.mxu0 %v4217_v2 }
 0xd51   :  { %3920 = vmatpush3.bf16.msra.mxu0 %v4107_v47 }
 0xd52   :  { %3921 = vmatprep.subr.bf16.mxu0 %v4217_v2 }
 0xd55   :  { %3922 = vmatpush3.bf16.msra.mxu0 %v4109_v41 }
 0xd56   :  { %3923 = vmatprep.subr.bf16.mxu0 %v4217_v2 }
 0xd59   :  { %3924 = vmatpush3.bf16.msra.mxu0 %v4111_v21 }
 0xd5a   :  { %3941 = vmatprep.subr.bf16.mxu0 %v4217_v2 }
 0xe1f   :  { %v2404_v46 = vpop.f32.mrb[76].mxu0 }
 0xe20   :  { %v2405_v55 = vadd.f32 %v2404_v46, %v2360_v42  ;;  %v3909_v14 = vpop.f32.mrb[77].mxu0 }
 0xe21   :  { %v2407_v44 = vpop.f32.mrb[78].mxu0 }
 0xe22   :  { %v2410_v50 = vmax.f32 %v2405_v55, 0.0  ;;  %v3910_v56 = vpop.f32.mrb[79].mxu0 }
 0xe24   :  { %v2413_v16 = vpack.c.bf16 %v2410_v50, %v2410_v50 }
 0xe26   :  { %v2427_v17 = vand.u32 %v2425_v15, %v2413_v16 }
 0xe28   :  { %3912 = vmatpush3.bf16.msra.mxu1 %v2427_v17 }
 0xe29   :  { %3929 = vmatprep.subr.bf16.mxu1 %v4217_v2 }
 0xe2b   :  { %3914 = vmatmul.mubr.msk.bf16.vlgmr.msra.gmra.mrb[76].mxu1 %vm2419_vm10, %v2412_v18 }
 0xe2c   :  { %3930 = vmatpush3.bf16.msra.mxu1 %v4106_v61  ;;  %3937 = vmatprep.mubr.msk.bf16.mxu1 %vm4218_vm1, %v4217_v2 }
 0xe2d   :  { %3931 = vmatprep.subr.bf16.mxu1 %v4217_v2 }
 0xe30   :  { %3932 = vmatpush3.bf16.msra.mxu1 %v4108_v63 }
 0xe31   :  { %3933 = vmatprep.subr.bf16.mxu1 %v4217_v2 }
 0xe34   :  { %3934 = vmatpush3.bf16.msra.mxu1 %v4110_v19 }
 0xe35   :  { %3935 = vmatprep.subr.bf16.mxu1 %v4217_v2 }
 0xe38   :  { %3936 = vmatpush3.bf16.msra.mxu1 %v4112_v22 }
 0xe39   :  { %3953 = vmatprep.subr.bf16.mxu1 %v4217_v2 }
 0xefe   :  { %v2463_v28 = vpop.f32.mrb[76].mxu1 }
 0xeff   :  { %v2464_v29 = vadd.f32 %v2463_v28, %v2417_v24  ;;  %v3915_v31 = vpop.f32.mrb[77].mxu1 }
 0xf00   :  { %v2466_v32 = vpop.f32.mrb[78].mxu1 }
 0xf01   :  { %v5164_v57 = vpack.c.bf16 %v2464_v29, %v5105_v39  ;;  %3348 = vst.msk [vmem:[%s5383_s23 + $0x8] sm:$0xff] %vm912_vm5, %v2464_v29  ;;  %v3916_v59 = vpop.f32.mrb[79].mxu1  ;;  %v4135_v39 = vld [vmem:[%s5385_s21 + $0xd8] sm:$0xff]  }
 0xf03   :  { %3926 = vmatmul.mubr.msk.bf16.vlgmr.msra.gmra.mrb[80].mxu0 %vm912_vm5, %v5164_v57  ;;  %3938 = vmatmul.mubr.msk.bf16.vlgmr.msra.gmra.mrb[80].mxu1 %vm912_vm5, %v5164_v57 }
 0xf04   :  { %3942 = vmatpush3.bf16.msra.mxu0 %v4113_v33  ;;  %3954 = vmatpush3.bf16.msra.mxu1 %v4114_v36 }
 0xf05   :  { %3943 = vmatprep.subr.bf16.mxu0 %v4217_v2  ;;  %3955 = vmatprep.subr.bf16.mxu1 %v4217_v2 }
 0xf06   :  { %3949 = vmatprep.mubr.msk.bf16.mxu0 %vm4218_vm1, %v4217_v2  ;;  %3961 = vmatprep.mubr.msk.bf16.mxu1 %vm4218_vm1, %v4217_v2 }
 0xf08   :  { %3944 = vmatpush3.bf16.msra.mxu0 %v4115_v60  ;;  %3956 = vmatpush3.bf16.msra.mxu1 %v4116_v40 }
 0xf09   :  { %3945 = vmatprep.subr.bf16.mxu0 %v4217_v2  ;;  %3957 = vmatprep.subr.bf16.mxu1 %v4217_v2 }
 0xf0c   :  { %3946 = vmatpush3.bf16.msra.mxu0 %v4117_v20  ;;  %3958 = vmatpush3.bf16.msra.mxu1 %v4118_v25 }
 0xf0d   :  { %3947 = vmatprep.subr.bf16.mxu0 %v4217_v2  ;;  %3959 = vmatprep.subr.bf16.mxu1 %v4217_v2 }
 0xf10   :  { %3948 = vmatpush3.bf16.msra.mxu0 %v4119_v48  ;;  %3960 = vmatpush3.bf16.msra.mxu1 %v4120_v1 }
 0xf11   :  { %3965 = vmatprep.subr.bf16.mxu0 %v4217_v2  ;;  %3977 = vmatprep.subr.bf16.mxu1 %v4217_v2 }
 0xf13   :  { %3950 = vmatmul.mubr.msk.bf16.vlgmr.msra.gmra.mrb[84].mxu0 %vm912_vm5, %v5164_v57  ;;  %3962 = vmatmul.mubr.msk.bf16.vlgmr.msra.gmra.mrb[84].mxu1 %vm912_vm5, %v5164_v57 }
 0xf14   :  { %3966 = vmatpush3.bf16.msra.mxu0 %v4121_v30  ;;  %3978 = vmatpush3.bf16.msra.mxu1 %v4122_v62 }
 0xf15   :  { %3967 = vmatprep.subr.bf16.mxu0 %v4217_v2  ;;  %3979 = vmatprep.subr.bf16.mxu1 %v4217_v2 }
 0xf16   :  { %3973 = vmatprep.mubr.msk.bf16.mxu0 %vm4218_vm1, %v4217_v2  ;;  %3985 = vmatprep.mubr.msk.bf16.mxu1 %vm4218_vm1, %v4217_v2 }
 0xf18   :  { %3968 = vmatpush3.bf16.msra.mxu0 %v4123_v26  ;;  %3980 = vmatpush3.bf16.msra.mxu1 %v4124_v3 }
 0xf19   :  { %3969 = vmatprep.subr.bf16.mxu0 %v4217_v2  ;;  %3981 = vmatprep.subr.bf16.mxu1 %v4217_v2 }
 0xf1c   :  { %3970 = vmatpush3.bf16.msra.mxu0 %v4125_v23  ;;  %3982 = vmatpush3.bf16.msra.mxu1 %v4126_v27  ;;  %v4143_v23 = vld [vmem:[%s5387_s17] ss:$8 sps:$4 sm:$0xff]   ;;  %v4144_v27 = vld [vmem:[%s5387_s17 + $0x14] ss:$8 sps:$4 sm:$0xff]  }
 0xf1d   :  { %3971 = vmatprep.subr.bf16.mxu0 %v4217_v2  ;;  %3983 = vmatprep.subr.bf16.mxu1 %v4217_v2 }
 0xf20   :  { %3972 = vmatpush3.bf16.msra.mxu0 %v4127_v58  ;;  %3984 = vmatpush3.bf16.msra.mxu1 %v4128_v4  ;;  %v4147_v58 = vld [vmem:[%s5387_s17 + $0x24] ss:$8 sps:$4 sm:$0xff]   ;;  %v4149_v4 = vld [vmem:[%s5387_s17 + $0x20] ss:$8 sps:$4 sm:$0xff]  }
 0xf21   :  { %3989 = vmatprep.subr.bf16.mxu0 %v4217_v2  ;;  %4001 = vmatprep.subr.bf16.mxu1 %v4217_v2 }
 0xf23   :  { %3974 = vmatmul.mubr.msk.bf16.vlgmr.msra.gmra.mrb[88].mxu0 %vm912_vm5, %v5164_v57  ;;  %3986 = vmatmul.mubr.msk.bf16.vlgmr.msra.gmra.mrb[88].mxu1 %vm912_vm5, %v5164_v57 }
 0xf24   :  { %3990 = vmatpush3.bf16.msra.mxu0 %v4129_v35  ;;  %4002 = vmatpush3.bf16.msra.mxu1 %v4130_v9  ;;  %v4150_v35 = vld [vmem:[%s5387_s17 + $0x34] ss:$8 sps:$4 sm:$0xff]   ;;  %v4152_v9 = vld [vmem:[%s5387_s17 + $0x30] ss:$8 sps:$4 sm:$0xff]  }
 0xf25   :  { %3991 = vmatprep.subr.bf16.mxu0 %v4217_v2  ;;  %4003 = vmatprep.subr.bf16.mxu1 %v4217_v2 }
 0xf26   :  { %3997 = vmatprep.mubr.msk.bf16.mxu0 %vm4218_vm1, %v4217_v2  ;;  %4009 = vmatprep.mubr.msk.bf16.mxu1 %vm4218_vm1, %v4217_v2 }
 0xf28   :  { %3992 = vmatpush3.bf16.msra.mxu0 %v4131_v37  ;;  %4004 = vmatpush3.bf16.msra.mxu1 %v4132_v38  ;;  %v4153_v37 = vld [vmem:[%s5387_s17 + $0x44] ss:$8 sps:$4 sm:$0xff]   ;;  %v4155_v38 = vld [vmem:[%s5387_s17 + $0x40] ss:$8 sps:$4 sm:$0xff]  }
 0xf29   :  { %3993 = vmatprep.subr.bf16.mxu0 %v4217_v2  ;;  %4005 = vmatprep.subr.bf16.mxu1 %v4217_v2 }
 0xf2c   :  { %3994 = vmatpush3.bf16.msra.mxu0 %v4133_v54  ;;  %4006 = vmatpush3.bf16.msra.mxu1 %v4134_v34 }
 0xf2d   :  { %3995 = vmatprep.subr.bf16.mxu0 %v4217_v2  ;;  %4007 = vmatprep.subr.bf16.mxu1 %v4217_v2 }
 0xf30   :  { %3996 = vmatpush3.bf16.msra.mxu0 %v4135_v39  ;;  %4008 = vmatpush3.bf16.msra.mxu1 %v4136_v43 }
 0xf31   :  { %4013 = vmatprep.subr.bf16.mxu0 %v4217_v2  ;;  %3209 = vmatprep.subr.bf16.mxu1 %v4216_v0 }
 0xf33   :  { %3998 = vmatmul.mubr.msk.bf16.vlgmr.msra.gmra.mrb[92].mxu0 %vm912_vm5, %v5164_v57  ;;  %4010 = vmatmul.mubr.msk.bf16.vlgmr.msra.gmra.mrb[92].mxu1 %vm912_vm5, %v5164_v57 }
 0xf34   :  { %4014 = vmatpush3.bf16.msra.mxu0 %v4137_v49  ;;  %4021 = vmatprep.mubr.msk.bf16.mxu0 %vm4218_vm1, %v4217_v2 }
 0xf35   :  { %4015 = vmatprep.subr.bf16.mxu0 %v4217_v2  ;;  %3520 = vmatprep.mubr.msk.bf16.mxu1 %vm2137_vm6, %v4141_v5 }
 0xf38   :  { %4016 = vmatpush3.bf16.msra.mxu0 %v4138_v51 }
 0xf39   :  { %4017 = vmatprep.subr.bf16.mxu0 %v4217_v2 }
 0xf3c   :  { %4018 = vmatpush3.bf16.msra.mxu0 %v4139_v52 }
 0xf3d   :  { %4019 = vmatprep.subr.bf16.mxu0 %v4217_v2 }
 0xf40   :  { %4020 = vmatpush3.bf16.msra.mxu0 %v4140_v53 }
 0xf41   :  { %4025 = vmatprep.subr.bf16.mxu0 %v4217_v2 }
 0xf43   :  { %4022 = vmatmul.mubr.msk.bf16.vlgmr.msra.gmra.mrb[96].mxu0 %vm912_vm5, %v5164_v57 }
 0xf44   :  { %4035 = vmatprep.mubr.msk.bf16.mxu0 %vm4218_vm1, %v4217_v2 }
 0xfd6   :  { %v2539_v6 = vpop.f32.mrb[80].mxu0  ;;  %v2613_v7 = vpop.f32.mrb[80].mxu1 }
 0xfd7   :  { %v3927_v8 = vpop.f32.mrb[81].mxu0  ;;  %v3939_v10 = vpop.f32.mrb[81].mxu1 }
 0xfd8   :  { %v2542_v45 = vpop.f32.mrb[82].mxu0  ;;  %v2616_v11 = vpop.f32.mrb[82].mxu1 }
 0xfd9   :  { %v2546_v47 = vpack.c.bf16 %v2542_v45, %v2539_v6  ;;  %v2620_v41 = vpack.c.bf16 %v2616_v11, %v2613_v7  ;;  %v3928_v42 = vpop.f32.mrb[83].mxu0  ;;  %v3940_v46 = vpop.f32.mrb[83].mxu1 }
 0xfdb   :  { %3210 = vmatpush1.bf16.msra.mxu1 %v2546_v47 }
 0xfdc   :  { %3211 = vmatprep.subr.bf16.mxu1 %v4216_v0 }
 0xfdf   :  { %3212 = vmatpush1.bf16.msra.mxu1 %v2620_v41 }
 0xfe0   :  { %3213 = vmatprep.subr.bf16.mxu1 %v4216_v0 }
 0xfe6   :  { %v2687_v55 = vpop.f32.mrb[84].mxu0  ;;  %v2761_v12 = vpop.f32.mrb[84].mxu1 }
 0xfe7   :  { %v3951_v13 = vpop.f32.mrb[85].mxu0  ;;  %v3963_v14 = vpop.f32.mrb[85].mxu1 }
 0xfe8   :  { %v2690_v44 = vpop.f32.mrb[86].mxu0  ;;  %v2764_v50 = vpop.f32.mrb[86].mxu1 }
 0xfe9   :  { %v2694_v56 = vpack.c.bf16 %v2690_v44, %v2687_v55  ;;  %v2768_v15 = vpack.c.bf16 %v2764_v50, %v2761_v12  ;;  %v3952_v16 = vpop.f32.mrb[87].mxu0  ;;  %v3964_v17 = vpop.f32.mrb[87].mxu1 }
 0xfeb   :  { %3214 = vmatpush1.bf16.msra.mxu1 %v2694_v56 }
 0xfec   :  { %3215 = vmatprep.subr.bf16.mxu1 %v4216_v0 }
 0xfef   :  { %3216 = vmatpush1.bf16.msra.mxu1 %v2768_v15 }
 0xff0   :  { %3217 = vmatprep.subr.bf16.mxu1 %v4216_v0 }
 0xff6   :  { %v2835_v18 = vpop.f32.mrb[88].mxu0  ;;  %v2909_v61 = vpop.f32.mrb[88].mxu1 }
 0xff7   :  { %v3975_v63 = vpop.f32.mrb[89].mxu0  ;;  %v3987_v19 = vpop.f32.mrb[89].mxu1 }
 0xff8   :  { %v2838_v21 = vpop.f32.mrb[90].mxu0  ;;  %v2912_v22 = vpop.f32.mrb[90].mxu1 }
 0xff9   :  { %v2842_v24 = vpack.c.bf16 %v2838_v21, %v2835_v18  ;;  %v2916_v28 = vpack.c.bf16 %v2912_v22, %v2909_v61  ;;  %v3976_v29 = vpop.f32.mrb[91].mxu0  ;;  %v3988_v31 = vpop.f32.mrb[91].mxu1 }
 0xffb   :  { %3218 = vmatpush1.bf16.msra.mxu1 %v2842_v24  ;;  %v3293_v24 = vld [vmem:[%s5388_s18] sm:$0xf] }
 0xffc   :  { %3219 = vmatprep.subr.bf16.mxu1 %v4216_v0 }
 0xfff   :  { %3220 = vmatpush1.bf16.msra.mxu1 %v2916_v28  ;;  %v3302_v28 = vpop.permute.xlu0 %3301 }
0x1000   :  { %3221 = vmatprep.subr.bf16.mxu1 %v4216_v0 }
0x1006   :  { %v2983_v32 = vpop.f32.mrb[92].mxu0  ;;  %v3057_v33 = vpop.f32.mrb[92].mxu1 }
0x1007   :  { %v3999_v36 = vpop.f32.mrb[93].mxu0  ;;  %v4011_v57 = vpop.f32.mrb[93].mxu1 }
0x1008   :  { %v2986_v59 = vpop.f32.mrb[94].mxu0  ;;  %v3060_v60 = vpop.f32.mrb[94].mxu1 }
0x1009   :  { %v2990_v40 = vpack.c.bf16 %v2986_v59, %v2983_v32  ;;  %v3064_v20 = vpack.c.bf16 %v3060_v60, %v3057_v33  ;;  %v4000_v25 = vpop.f32.mrb[95].mxu0  ;;  %v4012_v48 = vpop.f32.mrb[95].mxu1 }
0x100b   :  { %3222 = vmatpush1.bf16.msra.mxu1 %v2990_v40 }
0x100c   :  { %3223 = vmatprep.subr.bf16.mxu1 %v4216_v0 }
0x100f   :  { %3224 = vmatpush1.bf16.msra.mxu1 %v3064_v20 }
0x1010   :  { %3225 = vmatprep.subr.bf16.mxu1 %v4216_v0  ;;  %v4146_v0 = vld [vmem:[%s5387_s17 + $0x10] ss:$8 sps:$4 sm:$0xff]  }
0x1016   :  { %v3131_v1 = vpop.f32.mrb[96].mxu0 }
0x1017   :  { %v4023_v30 = vpop.f32.mrb[97].mxu0 }
0x1018   :  { %v3134_v62 = vpop.f32.mrb[98].mxu0 }
0x1019   :  { %v3138_v26 = vpack.c.bf16 %v3134_v62, %v3131_v1  ;;  %v4024_v3 = vpop.f32.mrb[99].mxu0 }
0x101b   :  { %3226 = vmatpush1.bf16.msra.mxu1 %v3138_v26 }
0x101e   :  { %3242 = vmatmul.mubr.bf16.vlgmr.msra.gmra.mrb[96].mxu1 %v4143_v23 }
0x101f   :  { %3521 = vmatprep.mubr.msk.bf16.mxu1 %vm2137_vm6, %v4144_v27 }
0x1026   :  { %3250 = vmatmul.mubr.bf16.gmra.mrb[100].mxu1 %v4146_v0 }
0x1027   :  { %3522 = vmatprep.mubr.msk.bf16.mxu1 %vm2137_vm6, %v4147_v58 }
0x102e   :  { %3258 = vmatmul.mubr.bf16.gmra.mrb[104].mxu1 %v4149_v4 }
0x102f   :  { %3523 = vmatprep.mubr.msk.bf16.mxu1 %vm2137_vm6, %v4150_v35 }
0x1036   :  { %3266 = vmatmul.mubr.bf16.gmra.mrb[108].mxu1 %v4152_v9 }
0x1037   :  { %3524 = vmatprep.mubr.msk.bf16.mxu1 %vm2137_vm6, %v4153_v37 }
0x103e   :  { %3274 = vmatmul.mubr.bf16.gmra.mrb[112].mxu1 %v4155_v38 }
0x10f1   :  { %v3243_v54 = vpop.f32.mrb[96].mxu1 }
0x10f2   :  { %v3245_v34 = vpop.f32.mrb[97].mxu1  ;;  %v3282_v43 = vmax.f32 %v3243_v54, 0.0 }
0x10f3   :  { %v3246_v39 = vpop.f32.mrb[98].mxu1 }
0x10f4   :  { %v3283_v49 = vmax.f32 %v3246_v39, 0.0  ;;  %v3248_v51 = vpop.f32.mrb[99].mxu1 }
0x10f6   :  { %v3294_v52 = vpack.c.bf16 %v3283_v49, %v3282_v43 }
0x10f8   :  { %4026 = vmatpush3.bf16.msra.mxu0 %v3294_v52 }
0x10f9   :  { %v3251_v53 = vpop.f32.mrb[100].mxu1  ;;  %4027 = vmatprep.subr.bf16.mxu0 %v4217_v2 }
0x10fa   :  { %v3253_v5 = vpop.f32.mrb[101].mxu1  ;;  %v3284_v7 = vmax.f32 %v3251_v53, 0.0 }
0x10fb   :  { %v3254_v6 = vpop.f32.mrb[102].mxu1 }
0x10fc   :  { %v3285_v8 = vmax.f32 %v3254_v6, 0.0  ;;  %v3256_v10 = vpop.f32.mrb[103].mxu1 }
0x10fe   :  { %v3295_v45 = vpack.c.bf16 %v3285_v8, %v3284_v7 }
0x1100   :  { %4028 = vmatpush3.bf16.msra.mxu0 %v3295_v45 }
0x1101   :  { %v3259_v11 = vpop.f32.mrb[104].mxu1  ;;  %4029 = vmatprep.subr.bf16.mxu0 %v4217_v2 }
0x1102   :  { %v3261_v47 = vpop.f32.mrb[105].mxu1  ;;  %v3286_v42 = vmax.f32 %v3259_v11, 0.0 }
0x1103   :  { %v3262_v41 = vpop.f32.mrb[106].mxu1 }
0x1104   :  { %v3287_v46 = vmax.f32 %v3262_v41, 0.0  ;;  %v3264_v55 = vpop.f32.mrb[107].mxu1 }
0x1106   :  { %v3296_v12 = vpack.c.bf16 %v3287_v46, %v3286_v42 }
0x1108   :  { %4030 = vmatpush3.bf16.msra.mxu0 %v3296_v12 }
0x1109   :  { %v3267_v13 = vpop.f32.mrb[108].mxu1  ;;  %4031 = vmatprep.subr.bf16.mxu0 %v4217_v2 }
0x110a   :  { %v3269_v14 = vpop.f32.mrb[109].mxu1  ;;  %v3288_v50 = vmax.f32 %v3267_v13, 0.0 }
0x110b   :  { %v3270_v44 = vpop.f32.mrb[110].mxu1 }
0x110c   :  { %v3289_v56 = vmax.f32 %v3270_v44, 0.0  ;;  %v3272_v15 = vpop.f32.mrb[111].mxu1 }
0x110e   :  { %v3297_v16 = vpack.c.bf16 %v3289_v56, %v3288_v50 }
0x1110   :  { %4032 = vmatpush3.bf16.msra.mxu0 %v3297_v16 }
0x1111   :  { %v3275_v17 = vpop.f32.mrb[112].mxu1  ;;  %4033 = vmatprep.subr.bf16.mxu0 %v4217_v2 }
0x1112   :  { %v3277_v18 = vpop.f32.mrb[113].mxu1  ;;  %v3290_v63 = vmax.f32 %v3275_v17, 0.0 }
0x1113   :  { %v3278_v61 = vpop.f32.mrb[114].mxu1 }
0x1114   :  { %v3291_v19 = vmax.f32 %v3278_v61, 0.0  ;;  %v3280_v21 = vpop.f32.mrb[115].mxu1 }
0x1116   :  { %v3298_v22 = vpack.c.bf16 %v3291_v19, %v3290_v63 }
0x1118   :  { %4034 = vmatpush3.bf16.msra.mxu0 %v3298_v22 }
0x111b   :  { %4036 = vmatmul.mubr.msk.bf16.vlgmr.msra.gmra.mrb[100].mxu0 %vm785_vm4, %v3293_v24 }
0x11ee   :  { %v3341_v29 = vpop.f32.mrb[100].mxu0 }
0x11ef   :  { %v3342_v31 = vadd.f32 %v3341_v29, %v3302_v28  ;;  %v4037_v32 = vpop.f32.mrb[101].mxu0 }
0x11f0   :  { %v3344_v33 = vpop.f32.mrb[102].mxu0 }
0x11f1   :  { %3349 = vst.msk [vmem:[%s5383_s23 + $0x10] sm:$0xff] %vm912_vm5, %v3342_v31  ;;  %v4038_v2 = vpop.f32.mrb[103].mxu0 }

</bundles_post_ra>
